<compile_context>
chip_gen: v5e
topology: v5e:2x2
jax: 0.10.0
libtpu: 0.0.40
codegen_flags: <defaults>
</compile_context>

<pallas_src>
import functools

import jax
import jax.numpy as jnp
from jax import lax
from jax.experimental import pallas as pl
from jax.experimental.pallas import tpu as pltpu


def _attn_kernel(xq_ref, xkv_ref, wq_t_ref, wkv_t_ref, wproj_t_ref, bproj_ref,
                 *rest, num_heads, head_dim, block_k, compute_dtype,
                 has_qkv_bias):
    """One (batch-block, query-tile) grid step.

    xq_ref      : (Bt, Nq, C)   VMEM  query-tile rows of x
    xkv_ref     : (Bt, N,  C)   VMEM  full-sequence rows of x (for K/V)
    wq_t_ref    : (C, D)        VMEM  pre-transposed, scale folded, cd
    wkv_t_ref   : (C, 2*D)      VMEM  pre-transposed, cd
    wproj_t_ref : (D, C)        VMEM  pre-transposed, cd
    bproj_ref   : (1, C)        VMEM  f32
    [bq_ref]    : (1, D)        VMEM  f32 (scale folded)   -- only if qkv_bias
    [bkv_ref]   : (1, 2*D)      VMEM  f32                  -- only if qkv_bias
    o_ref       : (Bt, Nq, C)   VMEM
    """
    if has_qkv_bias:
        bq_ref, bkv_ref = rest[0], rest[1]
    o_ref = rest[-1]

    Bt, Nq, C = xq_ref.shape
    N = xkv_ref.shape[1]
    D = num_heads * head_dim
    cd = compute_dtype
    num_k_tiles = N // block_k

    # ---- Q projection for the query tile (scale pre-folded on host) --------
    xq2 = xq_ref[...].reshape(Bt * Nq, C).astype(cd)
    q_all = jnp.dot(xq2, wq_t_ref[...], preferred_element_type=jnp.float32)
    if has_qkv_bias:
        q_all = q_all + bq_ref[...].astype(jnp.float32)
    q_all = q_all.astype(cd).reshape(Bt, Nq, D)         # cast ONCE

    # ---- K/V projection for the full sequence (one wide matmul) ------------
    xkv2 = xkv_ref[...].reshape(Bt * N, C).astype(cd)
    kv_all = jnp.dot(xkv2, wkv_t_ref[...], preferred_element_type=jnp.float32)
    if has_qkv_bias:
        kv_all = kv_all + bkv_ref[...].astype(jnp.float32)
    kv_all = kv_all.astype(cd).reshape(Bt, N, 2 * D)    # cast ONCE

    # ---- per-head flash-style attention over key tiles ----------------------
    ctx_heads = []
    for h in range(num_heads):
        lo = h * head_dim
        qh = q_all[:, :, lo:lo + head_dim]              # (Bt, Nq, hd) cd

        m = jnp.full((Bt, Nq, 1), -jnp.inf, jnp.float32)
        l = jnp.zeros((Bt, Nq, 1), jnp.float32)
        acc = jnp.zeros((Bt, Nq, head_dim), jnp.float32)
        for kt in range(num_k_tiles):
            ks = kt * block_k
            kh = kv_all[:, ks:ks + block_k, lo:lo + head_dim]
            vh = kv_all[:, ks:ks + block_k, D + lo:D + lo + head_dim]

            # scores: contract last dims, batch over Bt (no transposes).
            s = lax.dot_general(
                qh, kh, dimension_numbers=(((2,), (2,)), ((0,), (0,))),
                preferred_element_type=jnp.float32)     # (Bt, Nq, bk) f32

            m_new = jnp.maximum(m, jnp.max(s, axis=-1, keepdims=True))
            alpha = jnp.exp(m - m_new)
            # TODO(synk): optionally do exp / p*recip in bf16 on v6e/v7x.
            p = jnp.exp(s - m_new)
            l = alpha * l + jnp.sum(p, axis=-1, keepdims=True)
            acc = alpha * acc + lax.dot_general(
                p.astype(cd), vh,
                dimension_numbers=(((2,), (1,)), ((0,), (0,))),
                preferred_element_type=jnp.float32)     # (Bt, Nq, hd)
            m = m_new

        # attn_drop / proj_drop have p=0.0 (module default) -> identity.
        ctx_h = acc * pl.reciprocal(l, approx=True)     # EUP slot, VPU-free
        ctx_heads.append(ctx_h.astype(cd))

    # ---- single consolidated output projection: (rows, D) @ (D, C) ---------
    ctx = jnp.concatenate(ctx_heads, axis=-1).reshape(Bt * Nq, D)
    out = jnp.dot(ctx, wproj_t_ref[...], preferred_element_type=jnp.float32)
    out = out + bproj_ref[...].astype(jnp.float32)
    o_ref[...] = out.reshape(Bt, Nq, C).astype(o_ref.dtype)


def _pick_blocks(B, N, *, target_rows=512):
    """Pick (block_b, block_q): target ~512 rows/step, keep the query block a
    multiple of 8 (sublane-aligned reshape), and guarantee >= 2 grid steps
    whenever the problem permits (both v7x TensorCores get work)."""
    divs_b = [d for d in range(1, B + 1) if B % d == 0]
    divs_q = [d for d in range(1, N + 1) if N % d == 0]
    q8 = [d for d in divs_q if d % 8 == 0 and d <= target_rows]
    bq = max(q8) if q8 else N            # full-N block is always layout-legal
    b_ok = [d for d in divs_b if d * bq <= max(target_rows, bq)]
    bb = max(b_ok) if b_ok else 1

    def steps(bb_, bq_):
        return (B // bb_) * (N // bq_)

    if steps(bb, bq) == 1:
        smaller_b = [d for d in divs_b if d < bb]
        smaller_q8 = [d for d in q8 if d < bq]
        if smaller_b:
            bb = max(smaller_b)
        elif smaller_q8:
            bq = max(smaller_q8)
        # else: tiny problem, a single-step grid is unavoidable.
    return bb, bq


def _pick_block_k(N, *, target=512):
    divs = [d for d in range(1, N + 1) if N % d == 0 and d <= target]
    pref = ([d for d in divs if d % 128 == 0]
            or [d for d in divs if d % 8 == 0] or divs)
    return max(pref)


def _vmem_limit_bytes(block_b, block_q, block_k, N, C, D, x_item, cd_item):
    rows = block_b * block_q
    xq = rows * C * x_item * 2                    # double-buffered q-tile in
    xkv = block_b * N * C * x_item * 2            # double-buffered full-seq in
    out = rows * C * x_item * 2                   # double-buffered out
    w = (C * D + C * 2 * D + D * C + 4 * C + 3 * D) * cd_item * 2
    inter = (block_b * N * 2 * D * cd_item        # kv_all
             + rows * D * (cd_item + 4)           # q_all + ctx slab
             + block_b * block_q * block_k * 4 * 3  # score/p tiles (headroom)
             + rows * C * 4)                      # f32 projection accumulator
    est = xq + xkv + out + w + inter
    return int(min(max(2 * est, 32 * 2 ** 20), 64 * 2 ** 20))


def attention_forward(x, wqkv, wproj, bproj, qkv_bias=None, *,
                      num_heads, head_dim, scale,
                      compute_dtype=jnp.bfloat16,
                      block_b=None, block_q=None, block_k=None):
    """Forward pass of the CAE Attention module.

    x        : (B, N, C)
    wqkv     : (3*D, C)   qkv linear weight (no-bias layer)
    wproj    : (C, D)     output projection weight
    bproj    : (C,)       output projection bias
    qkv_bias : (3*D,) or None (None == module default qkv_bias=False)
    """
    B, N, C = x.shape
    D = num_heads * head_dim
    assert wqkv.shape == (3 * D, C)
    assert wproj.shape == (C, D)
    assert bproj.shape == (C,)

    # Host-side layout plumbing (free): split qkv weight, pre-transpose,
    # pre-cast, and fold `scale` into the Q columns / Q bias.
    wq_t = (wqkv[:D, :].T * scale).astype(compute_dtype)        # (C, D)
    wkv_t = wqkv[D:, :].T.astype(compute_dtype)                 # (C, 2D)
    wproj_t = wproj.T.astype(compute_dtype)                     # (D, C)
    bproj_r = bproj.reshape(1, C).astype(jnp.float32)
    has_qkv_bias = qkv_bias is not None
    if has_qkv_bias:
        bq_r = (qkv_bias[:D] * scale).reshape(1, D).astype(jnp.float32)
        bkv_r = qkv_bias[D:].reshape(1, 2 * D).astype(jnp.float32)

    if block_b is None or block_q is None:
        pb, pq = _pick_blocks(B, N)
        block_b = pb if block_b is None else block_b
        block_q = pq if block_q is None else block_q
    if block_k is None:
        block_k = _pick_block_k(N)
    assert B % block_b == 0 and N % block_q == 0 and N % block_k == 0

    grid = (B // block_b, N // block_q)
    kernel = functools.partial(
        _attn_kernel, num_heads=num_heads, head_dim=head_dim,
        block_k=block_k, compute_dtype=compute_dtype,
        has_qkv_bias=has_qkv_bias)

    cd_item = jnp.dtype(compute_dtype).itemsize
    vmem_limit = _vmem_limit_bytes(block_b, block_q, block_k, N, C, D,
                                   jnp.dtype(x.dtype).itemsize, cd_item)

    def _run(use_buffered):
        def const_spec(shape):
            idx = lambda b, q: (0,) * len(shape)
            if use_buffered:
                # Constant weight slabs never change block index: keep a
                # single buffer and spend the saved VMEM on activation tiles.
                return pl.BlockSpec(shape, idx, pipeline_mode=pl.Buffered(1))
            return pl.BlockSpec(shape, idx)

        in_specs = [
            pl.BlockSpec((block_b, block_q, C), lambda b, q: (b, q, 0)),
            pl.BlockSpec((block_b, N, C), lambda b, q: (b, 0, 0)),
            const_spec((C, D)),
            const_spec((C, 2 * D)),
            const_spec((D, C)),
            const_spec((1, C)),
        ]
        args = [x, x, wq_t, wkv_t, wproj_t, bproj_r]
        if has_qkv_bias:
            in_specs += [const_spec((1, D)), const_spec((1, 2 * D))]
            args += [bq_r, bkv_r]

        return pl.pallas_call(
            kernel,
            out_shape=jax.ShapeDtypeStruct((B, N, C), x.dtype),
            grid=grid,
            in_specs=in_specs,
            out_specs=pl.BlockSpec((block_b, block_q, C),
                                   lambda b, q: (b, q, 0)),
            compiler_params=pltpu.CompilerParams(
                dimension_semantics=("parallel", "parallel"),
                vmem_limit_bytes=vmem_limit),
        )(*args)

    try:
        return _run(True)
    except Exception:
        # Fallback for JAX builds where BlockSpec pipeline_mode / pl.Buffered
        # is not plumbed through the TPU pallas_call pipeline.
        return _run(False)


def reference_attention(x, wqkv, wproj, bproj, qkv_bias=None, *,
                        num_heads, head_dim, scale):
    """Pure-JAX transcription of the PyTorch forward (for verification)."""
    B, N, C = x.shape
    D = num_heads * head_dim
    b = qkv_bias if qkv_bias is not None else jnp.zeros((3 * D,), x.dtype)
    qkv = x @ wqkv.T + b
    qkv = qkv.reshape(B, N, 3, num_heads, head_dim).transpose(2, 0, 3, 1, 4)
    q, k, v = qkv[0], qkv[1], qkv[2]
    q = q * scale
    attn = jax.nn.softmax(q @ jnp.swapaxes(k, -2, -1), axis=-1)
    out = (attn @ v).transpose(0, 2, 1, 3).reshape(B, N, D)
    return out @ wproj.T + bproj


def _run_case(name, *, B, N, C, num_heads, head_dim, use_bias,
              block_k=None, tol=2e-2, seed=0):
    D = num_heads * head_dim
    scale = head_dim ** (-0.5)
    key = jax.random.PRNGKey(seed)
    kx, kqkv, kproj, kpb, kqb, kvb = jax.random.split(key, 6)

    x = jax.random.normal(kx, (B, N, C), dtype=jnp.float32)
    wqkv = jax.random.normal(kqkv, (3 * D, C), dtype=jnp.float32) * 0.05
    wproj = jax.random.normal(kproj, (C, D), dtype=jnp.float32) * 0.05
    bproj = jax.random.normal(kpb, (C,), dtype=jnp.float32) * 0.05

    qkv_bias = None
    if use_bias:
        # Module builds cat(q_bias, zeros_like(v_bias), v_bias).
        q_b = jax.random.normal(kqb, (D,), dtype=jnp.float32) * 0.05
        v_b = jax.random.normal(kvb, (D,), dtype=jnp.float32) * 0.05
        qkv_bias = jnp.concatenate([q_b, jnp.zeros((D,), jnp.float32), v_b])

    out = attention_forward(x, wqkv, wproj, bproj, qkv_bias,
                            num_heads=num_heads, head_dim=head_dim,
                            scale=scale, block_k=block_k)
    out = jax.block_until_ready(out)

    ref = reference_attention(x, wqkv, wproj, bproj, qkv_bias,
                              num_heads=num_heads, head_dim=head_dim,
                              scale=scale)
    assert out.shape == (B, N, C)
    err = float(jnp.max(jnp.abs(out - ref)))
    # bf16 MXU inputs (f32 accumulation) + approx reciprocal -> looser
    # tolerance than pure-f32.
    assert jnp.allclose(out, ref, atol=tol, rtol=tol), (name, err)


if __name__ == "__main__":
    # Small config consistent with the module: dim=32, num_heads=4 -> head_dim=8.
    # qkv_bias=False (module default) -> the bias add is compiled out.
    _run_case("small", B=2, N=8, C=32, num_heads=4, head_dim=8, use_bias=False)

    # Realistic-layout check: 64-lane head slices, query tiling (grid of 2),
    # two key tiles (exercises the online-softmax flash path), qkv_bias=True.
    _run_case("layout", B=1, N=128, C=256, num_heads=4, head_dim=64,
              use_bias=True, block_k=64, tol=3e-2)

    print("KERNEL_OK")
</pallas_src>

<mosaic_0001>
module attributes {stable_mosaic.version = 11 : i64} {
  func.func @_attn_kernel(%arg0: i32, %arg1: i32, %arg2: memref<1x8x32xf32, #tpu.memory_space<vmem>>, %arg3: memref<1x8x32xf32, #tpu.memory_space<vmem>>, %arg4: memref<32x32xbf16, #tpu.memory_space<vmem>>, %arg5: memref<32x64xbf16, #tpu.memory_space<vmem>>, %arg6: memref<32x32xbf16, #tpu.memory_space<vmem>>, %arg7: memref<1x32xf32, #tpu.memory_space<vmem>>, %arg8: memref<1x8x32xf32, #tpu.memory_space<vmem>>) attributes {dimension_semantics = [#tpu.dimension_semantics<parallel>, #tpu.dimension_semantics<parallel>], iteration_bounds = array<i64: 2, 1>, scalar_prefetch = 0 : i64, scratch_operands = 0 : i64, tpu.core_type = #tpu.core_type<tc>, window_params = [{transform_indices = @transform_0, window_bounds = array<i64: 1, 8, 32>}, {transform_indices = @transform_1, window_bounds = array<i64: 1, 8, 32>}, {pipeline_mode = #tpu.pipeline_mode<synchronous>, transform_indices = @transform_2, window_bounds = array<i64: 32, 32>}, {pipeline_mode = #tpu.pipeline_mode<synchronous>, transform_indices = @transform_3, window_bounds = array<i64: 32, 64>}, {pipeline_mode = #tpu.pipeline_mode<synchronous>, transform_indices = @transform_4, window_bounds = array<i64: 32, 32>}, {pipeline_mode = #tpu.pipeline_mode<synchronous>, transform_indices = @transform_5, window_bounds = array<i64: 1, 32>}, {transform_indices = @transform_6, window_bounds = array<i64: 1, 8, 32>}]} {
    %c0 = arith.constant 0 : index
    %c0_0 = arith.constant 0 : index
    %c0_1 = arith.constant 0 : index
    %0 = vector.load %arg2[%c0, %c0_0, %c0_1] : memref<1x8x32xf32, #tpu.memory_space<vmem>>, vector<1x8x32xf32>
    %1 = vector.shape_cast %0 : vector<1x8x32xf32> to vector<8x32xf32>
    %2 = arith.truncf %1 : vector<8x32xf32> to vector<8x32xbf16>
    %c0_2 = arith.constant 0 : index
    %c0_3 = arith.constant 0 : index
    %3 = vector.load %arg4[%c0_2, %c0_3] : memref<32x32xbf16, #tpu.memory_space<vmem>>, vector<32x32xbf16>
    %cst = arith.constant dense<0.000000e+00> : vector<8x32xf32>
    %4 = tpu.matmul %2, %3, %cst {dimension_numbers = #tpu.dot_dimension_numbers<[1], [0], [0], [1], [0, 0, 1, 1], [], []>} : vector<8x32xbf16>, vector<32x32xbf16>, vector<8x32xf32> -> vector<8x32xf32>
    %5 = arith.truncf %4 : vector<8x32xf32> to vector<8x32xbf16>
    %6 = vector.shape_cast %5 : vector<8x32xbf16> to vector<1x8x32xbf16>
    %c0_4 = arith.constant 0 : index
    %c0_5 = arith.constant 0 : index
    %c0_6 = arith.constant 0 : index
    %7 = vector.load %arg3[%c0_4, %c0_5, %c0_6] : memref<1x8x32xf32, #tpu.memory_space<vmem>>, vector<1x8x32xf32>
    %8 = vector.shape_cast %7 : vector<1x8x32xf32> to vector<8x32xf32>
    %9 = arith.truncf %8 : vector<8x32xf32> to vector<8x32xbf16>
    %c0_7 = arith.constant 0 : index
    %c0_8 = arith.constant 0 : index
    %10 = vector.load %arg5[%c0_7, %c0_8] : memref<32x64xbf16, #tpu.memory_space<vmem>>, vector<32x64xbf16>
    %cst_9 = arith.constant dense<0.000000e+00> : vector<8x64xf32>
    %11 = tpu.matmul %9, %10, %cst_9 {dimension_numbers = #tpu.dot_dimension_numbers<[1], [0], [0], [1], [0, 0, 1, 1], [], []>} : vector<8x32xbf16>, vector<32x64xbf16>, vector<8x64xf32> -> vector<8x64xf32>
    %12 = arith.truncf %11 : vector<8x64xf32> to vector<8x64xbf16>
    %13 = vector.shape_cast %12 : vector<8x64xbf16> to vector<1x8x64xbf16>
    %14 = vector.extract_strided_slice %6 {offsets = [0, 0, 0], sizes = [1, 8, 8], strides = [1, 1, 1]} : vector<1x8x32xbf16> to vector<1x8x8xbf16>
    %cst_10 = arith.constant 0xFF800000 : f32
    %15 = vector.broadcast %cst_10 : f32 to vector<1x8x1xf32>
    %cst_11 = arith.constant 0.000000e+00 : f32
    %16 = vector.broadcast %cst_11 : f32 to vector<1x8x1xf32>
    %cst_12 = arith.constant 0.000000e+00 : f32
    %17 = vector.broadcast %cst_12 : f32 to vector<1x8x8xf32>
    %18 = vector.extract_strided_slice %13 {offsets = [0, 0, 0], sizes = [1, 8, 8], strides = [1, 1, 1]} : vector<1x8x64xbf16> to vector<1x8x8xbf16>
    %19 = vector.extract_strided_slice %13 {offsets = [0, 0, 32], sizes = [1, 8, 8], strides = [1, 1, 1]} : vector<1x8x64xbf16> to vector<1x8x8xbf16>
    %cst_13 = arith.constant dense<0.000000e+00> : vector<1x8x8xf32>
    %20 = tpu.matmul %14, %18, %cst_13 {dimension_numbers = #tpu.dot_dimension_numbers<[2], [2], [1], [1], [0, 0, 0, 1, 1, 1], [0], [0]>} : vector<1x8x8xbf16>, vector<1x8x8xbf16>, vector<1x8x8xf32> -> vector<1x8x8xf32>
    %cst_14 = arith.constant dense<0xFF800000> : vector<1x8xf32>
    %21 = vector.multi_reduction <maximumf>, %20, %cst_14 [2] : vector<1x8x8xf32> to vector<1x8xf32>
    %22 = vector.shape_cast %21 : vector<1x8xf32> to vector<1x8x1xf32>
    %23 = arith.maximumf %15, %22 : vector<1x8x1xf32>
    %24 = arith.subf %15, %23 : vector<1x8x1xf32>
    %25 = math.exp %24 : vector<1x8x1xf32>
    %26 = vector.broadcast %23 : vector<1x8x1xf32> to vector<1x8x8xf32>
    %27 = arith.subf %20, %26 : vector<1x8x8xf32>
    %28 = math.exp %27 : vector<1x8x8xf32>
    %29 = arith.mulf %25, %16 : vector<1x8x1xf32>
    %cst_15 = arith.constant dense<0.000000e+00> : vector<1x8xf32>
    %30 = vector.multi_reduction <add>, %28, %cst_15 [2] : vector<1x8x8xf32> to vector<1x8xf32>
    %31 = vector.shape_cast %30 : vector<1x8xf32> to vector<1x8x1xf32>
    %32 = arith.addf %29, %31 : vector<1x8x1xf32>
    %33 = vector.broadcast %25 : vector<1x8x1xf32> to vector<1x8x8xf32>
    %34 = arith.mulf %33, %17 : vector<1x8x8xf32>
    %35 = arith.truncf %28 : vector<1x8x8xf32> to vector<1x8x8xbf16>
    %cst_16 = arith.constant dense<0.000000e+00> : vector<1x8x8xf32>
    %36 = tpu.matmul %35, %19, %cst_16 {dimension_numbers = #tpu.dot_dimension_numbers<[2], [1], [1], [2], [0, 0, 0, 1, 1, 2], [0], [0]>} : vector<1x8x8xbf16>, vector<1x8x8xbf16>, vector<1x8x8xf32> -> vector<1x8x8xf32>
    %37 = arith.addf %34, %36 : vector<1x8x8xf32>
    %38 = tpu.reciprocal %32 {approx = true} : vector<1x8x1xf32> -> vector<1x8x1xf32>
    %39 = vector.broadcast %38 : vector<1x8x1xf32> to vector<1x8x8xf32>
    %40 = arith.mulf %37, %39 : vector<1x8x8xf32>
    %41 = arith.truncf %40 : vector<1x8x8xf32> to vector<1x8x8xbf16>
    %42 = vector.extract_strided_slice %6 {offsets = [0, 0, 8], sizes = [1, 8, 8], strides = [1, 1, 1]} : vector<1x8x32xbf16> to vector<1x8x8xbf16>
    %cst_17 = arith.constant 0xFF800000 : f32
    %43 = vector.broadcast %cst_17 : f32 to vector<1x8x1xf32>
    %cst_18 = arith.constant 0.000000e+00 : f32
    %44 = vector.broadcast %cst_18 : f32 to vector<1x8x1xf32>
    %cst_19 = arith.constant 0.000000e+00 : f32
    %45 = vector.broadcast %cst_19 : f32 to vector<1x8x8xf32>
    %46 = vector.extract_strided_slice %13 {offsets = [0, 0, 8], sizes = [1, 8, 8], strides = [1, 1, 1]} : vector<1x8x64xbf16> to vector<1x8x8xbf16>
    %47 = vector.extract_strided_slice %13 {offsets = [0, 0, 40], sizes = [1, 8, 8], strides = [1, 1, 1]} : vector<1x8x64xbf16> to vector<1x8x8xbf16>
    %cst_20 = arith.constant dense<0.000000e+00> : vector<1x8x8xf32>
    %48 = tpu.matmul %42, %46, %cst_20 {dimension_numbers = #tpu.dot_dimension_numbers<[2], [2], [1], [1], [0, 0, 0, 1, 1, 1], [0], [0]>} : vector<1x8x8xbf16>, vector<1x8x8xbf16>, vector<1x8x8xf32> -> vector<1x8x8xf32>
    %cst_21 = arith.constant dense<0xFF800000> : vector<1x8xf32>
    %49 = vector.multi_reduction <maximumf>, %48, %cst_21 [2] : vector<1x8x8xf32> to vector<1x8xf32>
    %50 = vector.shape_cast %49 : vector<1x8xf32> to vector<1x8x1xf32>
    %51 = arith.maximumf %43, %50 : vector<1x8x1xf32>
    %52 = arith.subf %43, %51 : vector<1x8x1xf32>
    %53 = math.exp %52 : vector<1x8x1xf32>
    %54 = vector.broadcast %51 : vector<1x8x1xf32> to vector<1x8x8xf32>
    %55 = arith.subf %48, %54 : vector<1x8x8xf32>
    %56 = math.exp %55 : vector<1x8x8xf32>
    %57 = arith.mulf %53, %44 : vector<1x8x1xf32>
    %cst_22 = arith.constant dense<0.000000e+00> : vector<1x8xf32>
    %58 = vector.multi_reduction <add>, %56, %cst_22 [2] : vector<1x8x8xf32> to vector<1x8xf32>
    %59 = vector.shape_cast %58 : vector<1x8xf32> to vector<1x8x1xf32>
    %60 = arith.addf %57, %59 : vector<1x8x1xf32>
    %61 = vector.broadcast %53 : vector<1x8x1xf32> to vector<1x8x8xf32>
    %62 = arith.mulf %61, %45 : vector<1x8x8xf32>
    %63 = arith.truncf %56 : vector<1x8x8xf32> to vector<1x8x8xbf16>
    %cst_23 = arith.constant dense<0.000000e+00> : vector<1x8x8xf32>
    %64 = tpu.matmul %63, %47, %cst_23 {dimension_numbers = #tpu.dot_dimension_numbers<[2], [1], [1], [2], [0, 0, 0, 1, 1, 2], [0], [0]>} : vector<1x8x8xbf16>, vector<1x8x8xbf16>, vector<1x8x8xf32> -> vector<1x8x8xf32>
    %65 = arith.addf %62, %64 : vector<1x8x8xf32>
    %66 = tpu.reciprocal %60 {approx = true} : vector<1x8x1xf32> -> vector<1x8x1xf32>
    %67 = vector.broadcast %66 : vector<1x8x1xf32> to vector<1x8x8xf32>
    %68 = arith.mulf %65, %67 : vector<1x8x8xf32>
    %69 = arith.truncf %68 : vector<1x8x8xf32> to vector<1x8x8xbf16>
    %70 = vector.extract_strided_slice %6 {offsets = [0, 0, 16], sizes = [1, 8, 8], strides = [1, 1, 1]} : vector<1x8x32xbf16> to vector<1x8x8xbf16>
    %cst_24 = arith.constant 0xFF800000 : f32
    %71 = vector.broadcast %cst_24 : f32 to vector<1x8x1xf32>
    %cst_25 = arith.constant 0.000000e+00 : f32
    %72 = vector.broadcast %cst_25 : f32 to vector<1x8x1xf32>
    %cst_26 = arith.constant 0.000000e+00 : f32
    %73 = vector.broadcast %cst_26 : f32 to vector<1x8x8xf32>
    %74 = vector.extract_strided_slice %13 {offsets = [0, 0, 16], sizes = [1, 8, 8], strides = [1, 1, 1]} : vector<1x8x64xbf16> to vector<1x8x8xbf16>
    %75 = vector.extract_strided_slice %13 {offsets = [0, 0, 48], sizes = [1, 8, 8], strides = [1, 1, 1]} : vector<1x8x64xbf16> to vector<1x8x8xbf16>
    %cst_27 = arith.constant dense<0.000000e+00> : vector<1x8x8xf32>
    %76 = tpu.matmul %70, %74, %cst_27 {dimension_numbers = #tpu.dot_dimension_numbers<[2], [2], [1], [1], [0, 0, 0, 1, 1, 1], [0], [0]>} : vector<1x8x8xbf16>, vector<1x8x8xbf16>, vector<1x8x8xf32> -> vector<1x8x8xf32>
    %cst_28 = arith.constant dense<0xFF800000> : vector<1x8xf32>
    %77 = vector.multi_reduction <maximumf>, %76, %cst_28 [2] : vector<1x8x8xf32> to vector<1x8xf32>
    %78 = vector.shape_cast %77 : vector<1x8xf32> to vector<1x8x1xf32>
    %79 = arith.maximumf %71, %78 : vector<1x8x1xf32>
    %80 = arith.subf %71, %79 : vector<1x8x1xf32>
    %81 = math.exp %80 : vector<1x8x1xf32>
    %82 = vector.broadcast %79 : vector<1x8x1xf32> to vector<1x8x8xf32>
    %83 = arith.subf %76, %82 : vector<1x8x8xf32>
    %84 = math.exp %83 : vector<1x8x8xf32>
    %85 = arith.mulf %81, %72 : vector<1x8x1xf32>
    %cst_29 = arith.constant dense<0.000000e+00> : vector<1x8xf32>
    %86 = vector.multi_reduction <add>, %84, %cst_29 [2] : vector<1x8x8xf32> to vector<1x8xf32>
    %87 = vector.shape_cast %86 : vector<1x8xf32> to vector<1x8x1xf32>
    %88 = arith.addf %85, %87 : vector<1x8x1xf32>
    %89 = vector.broadcast %81 : vector<1x8x1xf32> to vector<1x8x8xf32>
    %90 = arith.mulf %89, %73 : vector<1x8x8xf32>
    %91 = arith.truncf %84 : vector<1x8x8xf32> to vector<1x8x8xbf16>
    %cst_30 = arith.constant dense<0.000000e+00> : vector<1x8x8xf32>
    %92 = tpu.matmul %91, %75, %cst_30 {dimension_numbers = #tpu.dot_dimension_numbers<[2], [1], [1], [2], [0, 0, 0, 1, 1, 2], [0], [0]>} : vector<1x8x8xbf16>, vector<1x8x8xbf16>, vector<1x8x8xf32> -> vector<1x8x8xf32>
    %93 = arith.addf %90, %92 : vector<1x8x8xf32>
    %94 = tpu.reciprocal %88 {approx = true} : vector<1x8x1xf32> -> vector<1x8x1xf32>
    %95 = vector.broadcast %94 : vector<1x8x1xf32> to vector<1x8x8xf32>
    %96 = arith.mulf %93, %95 : vector<1x8x8xf32>
    %97 = arith.truncf %96 : vector<1x8x8xf32> to vector<1x8x8xbf16>
    %98 = vector.extract_strided_slice %6 {offsets = [0, 0, 24], sizes = [1, 8, 8], strides = [1, 1, 1]} : vector<1x8x32xbf16> to vector<1x8x8xbf16>
    %cst_31 = arith.constant 0xFF800000 : f32
    %99 = vector.broadcast %cst_31 : f32 to vector<1x8x1xf32>
    %cst_32 = arith.constant 0.000000e+00 : f32
    %100 = vector.broadcast %cst_32 : f32 to vector<1x8x1xf32>
    %cst_33 = arith.constant 0.000000e+00 : f32
    %101 = vector.broadcast %cst_33 : f32 to vector<1x8x8xf32>
    %102 = vector.extract_strided_slice %13 {offsets = [0, 0, 24], sizes = [1, 8, 8], strides = [1, 1, 1]} : vector<1x8x64xbf16> to vector<1x8x8xbf16>
    %103 = vector.extract_strided_slice %13 {offsets = [0, 0, 56], sizes = [1, 8, 8], strides = [1, 1, 1]} : vector<1x8x64xbf16> to vector<1x8x8xbf16>
    %cst_34 = arith.constant dense<0.000000e+00> : vector<1x8x8xf32>
    %104 = tpu.matmul %98, %102, %cst_34 {dimension_numbers = #tpu.dot_dimension_numbers<[2], [2], [1], [1], [0, 0, 0, 1, 1, 1], [0], [0]>} : vector<1x8x8xbf16>, vector<1x8x8xbf16>, vector<1x8x8xf32> -> vector<1x8x8xf32>
    %cst_35 = arith.constant dense<0xFF800000> : vector<1x8xf32>
    %105 = vector.multi_reduction <maximumf>, %104, %cst_35 [2] : vector<1x8x8xf32> to vector<1x8xf32>
    %106 = vector.shape_cast %105 : vector<1x8xf32> to vector<1x8x1xf32>
    %107 = arith.maximumf %99, %106 : vector<1x8x1xf32>
    %108 = arith.subf %99, %107 : vector<1x8x1xf32>
    %109 = math.exp %108 : vector<1x8x1xf32>
    %110 = vector.broadcast %107 : vector<1x8x1xf32> to vector<1x8x8xf32>
    %111 = arith.subf %104, %110 : vector<1x8x8xf32>
    %112 = math.exp %111 : vector<1x8x8xf32>
    %113 = arith.mulf %109, %100 : vector<1x8x1xf32>
    %cst_36 = arith.constant dense<0.000000e+00> : vector<1x8xf32>
    %114 = vector.multi_reduction <add>, %112, %cst_36 [2] : vector<1x8x8xf32> to vector<1x8xf32>
    %115 = vector.shape_cast %114 : vector<1x8xf32> to vector<1x8x1xf32>
    %116 = arith.addf %113, %115 : vector<1x8x1xf32>
    %117 = vector.broadcast %109 : vector<1x8x1xf32> to vector<1x8x8xf32>
    %118 = arith.mulf %117, %101 : vector<1x8x8xf32>
    %119 = arith.truncf %112 : vector<1x8x8xf32> to vector<1x8x8xbf16>
    %cst_37 = arith.constant dense<0.000000e+00> : vector<1x8x8xf32>
    %120 = tpu.matmul %119, %103, %cst_37 {dimension_numbers = #tpu.dot_dimension_numbers<[2], [1], [1], [2], [0, 0, 0, 1, 1, 2], [0], [0]>} : vector<1x8x8xbf16>, vector<1x8x8xbf16>, vector<1x8x8xf32> -> vector<1x8x8xf32>
    %121 = arith.addf %118, %120 : vector<1x8x8xf32>
    %122 = tpu.reciprocal %116 {approx = true} : vector<1x8x1xf32> -> vector<1x8x1xf32>
    %123 = vector.broadcast %122 : vector<1x8x1xf32> to vector<1x8x8xf32>
    %124 = arith.mulf %121, %123 : vector<1x8x8xf32>
    %125 = arith.truncf %124 : vector<1x8x8xf32> to vector<1x8x8xbf16>
    %126 = tpu.concatenate %41, %69, %97, %125 in 2 : vector<1x8x8xbf16>, vector<1x8x8xbf16>, vector<1x8x8xbf16>, vector<1x8x8xbf16> -> vector<1x8x32xbf16>
    %127 = vector.shape_cast %126 : vector<1x8x32xbf16> to vector<8x32xbf16>
    %c0_38 = arith.constant 0 : index
    %c0_39 = arith.constant 0 : index
    %128 = vector.load %arg6[%c0_38, %c0_39] : memref<32x32xbf16, #tpu.memory_space<vmem>>, vector<32x32xbf16>
    %cst_40 = arith.constant dense<0.000000e+00> : vector<8x32xf32>
    %129 = tpu.matmul %127, %128, %cst_40 {dimension_numbers = #tpu.dot_dimension_numbers<[1], [0], [0], [1], [0, 0, 1, 1], [], []>} : vector<8x32xbf16>, vector<32x32xbf16>, vector<8x32xf32> -> vector<8x32xf32>
    %c0_41 = arith.constant 0 : index
    %c0_42 = arith.constant 0 : index
    %130 = vector.load %arg7[%c0_41, %c0_42] : memref<1x32xf32, #tpu.memory_space<vmem>>, vector<1x32xf32>
    %131 = vector.broadcast %130 : vector<1x32xf32> to vector<8x32xf32>
    %132 = arith.addf %129, %131 : vector<8x32xf32>
    %133 = vector.shape_cast %132 : vector<8x32xf32> to vector<1x8x32xf32>
    %c0_43 = arith.constant 0 : index
    %c0_44 = arith.constant 0 : index
    %c0_45 = arith.constant 0 : index
    %134 = vector.load %arg8[%c0_43, %c0_44, %c0_45] : memref<1x8x32xf32, #tpu.memory_space<vmem>>, vector<1x8x32xf32>
    tpu.vector_store %arg8[%c0_43, %c0_44, %c0_45], %133 {strides = array<i32>} : memref<1x8x32xf32, #tpu.memory_space<vmem>>, vector<1x8x32xf32>,
    return
  }
  func.func @transform_0(%arg0: i32, %arg1: i32) -> (i32, i32, i32) {
    %c0_i32 = arith.constant 0 : i32
    %c0_i32_0 = arith.constant 0 : i32
    return %arg0, %arg1, %c0_i32 : i32, i32, i32
  }
  func.func @transform_1(%arg0: i32, %arg1: i32) -> (i32, i32, i32) {
    %c0_i32 = arith.constant 0 : i32
    %c0_i32_0 = arith.constant 0 : i32
    %c0_i32_1 = arith.constant 0 : i32
    return %arg0, %c0_i32, %c0_i32_0 : i32, i32, i32
  }
  func.func @transform_2(%arg0: i32, %arg1: i32) -> (i32, i32) {
    %c0_i32 = arith.constant 0 : i32
    %c0_i32_0 = arith.constant 0 : i32
    %c0_i32_1 = arith.constant 0 : i32
    return %c0_i32, %c0_i32_0 : i32, i32
  }
  func.func @transform_3(%arg0: i32, %arg1: i32) -> (i32, i32) {
    %c0_i32 = arith.constant 0 : i32
    %c0_i32_0 = arith.constant 0 : i32
    %c0_i32_1 = arith.constant 0 : i32
    return %c0_i32, %c0_i32_0 : i32, i32
  }
  func.func @transform_4(%arg0: i32, %arg1: i32) -> (i32, i32) {
    %c0_i32 = arith.constant 0 : i32
    %c0_i32_0 = arith.constant 0 : i32
    %c0_i32_1 = arith.constant 0 : i32
    return %c0_i32, %c0_i32_0 : i32, i32
  }
  func.func @transform_5(%arg0: i32, %arg1: i32) -> (i32, i32) {
    %c0_i32 = arith.constant 0 : i32
    %c0_i32_0 = arith.constant 0 : i32
    %c0_i32_1 = arith.constant 0 : i32
    return %c0_i32, %c0_i32_0 : i32, i32
  }
  func.func @transform_6(%arg0: i32, %arg1: i32) -> (i32, i32, i32) {
    %c0_i32 = arith.constant 0 : i32
    %c0_i32_0 = arith.constant 0 : i32
    return %arg0, %arg1, %c0_i32 : i32, i32, i32
  }
}

module attributes {stable_mosaic.version = 11 : i64} {
  func.func @_attn_kernel(%arg0: i32, %arg1: i32, %arg2: memref<1x8x32xf32, #tpu.memory_space<vmem>>, %arg3: memref<1x8x32xf32, #tpu.memory_space<vmem>>, %arg4: memref<32x32xbf16, #tpu.memory_space<vmem>>, %arg5: memref<32x64xbf16, #tpu.memory_space<vmem>>, %arg6: memref<32x32xbf16, #tpu.memory_space<vmem>>, %arg7: memref<1x32xf32, #tpu.memory_space<vmem>>, %arg8: memref<1x8x32xf32, #tpu.memory_space<vmem>>) attributes {dimension_semantics = [#tpu.dimension_semantics<parallel>, #tpu.dimension_semantics<parallel>], iteration_bounds = array<i64: 2, 1>, scalar_prefetch = 0 : i64, scratch_operands = 0 : i64, tpu.core_type = #tpu.core_type<tc>, window_params = [{transform_indices = @transform_0, window_bounds = array<i64: 1, 8, 32>}, {transform_indices = @transform_1, window_bounds = array<i64: 1, 8, 32>}, {pipeline_mode = #tpu.pipeline_mode<synchronous>, transform_indices = @transform_2, window_bounds = array<i64: 32, 32>}, {pipeline_mode = #tpu.pipeline_mode<synchronous>, transform_indices = @transform_3, window_bounds = array<i64: 32, 64>}, {pipeline_mode = #tpu.pipeline_mode<synchronous>, transform_indices = @transform_4, window_bounds = array<i64: 32, 32>}, {pipeline_mode = #tpu.pipeline_mode<synchronous>, transform_indices = @transform_5, window_bounds = array<i64: 1, 32>}, {transform_indices = @transform_6, window_bounds = array<i64: 1, 8, 32>}]} {
    %c0 = arith.constant 0 : index
    %c0_0 = arith.constant 0 : index
    %c0_1 = arith.constant 0 : index
    %0 = vector.load %arg2[%c0, %c0_0, %c0_1] : memref<1x8x32xf32, #tpu.memory_space<vmem>>, vector<1x8x32xf32>
    %1 = vector.shape_cast %0 : vector<1x8x32xf32> to vector<8x32xf32>
    %2 = arith.truncf %1 : vector<8x32xf32> to vector<8x32xbf16>
    %c0_2 = arith.constant 0 : index
    %c0_3 = arith.constant 0 : index
    %3 = vector.load %arg4[%c0_2, %c0_3] : memref<32x32xbf16, #tpu.memory_space<vmem>>, vector<32x32xbf16>
    %cst = arith.constant dense<0.000000e+00> : vector<8x32xf32>
    %4 = tpu.matmul %2, %3, %cst {dimension_numbers = #tpu.dot_dimension_numbers<[1], [0], [0], [1], [0, 0, 1, 1], [], []>} : vector<8x32xbf16>, vector<32x32xbf16>, vector<8x32xf32> -> vector<8x32xf32>
    %5 = arith.truncf %4 : vector<8x32xf32> to vector<8x32xbf16>
    %6 = vector.shape_cast %5 : vector<8x32xbf16> to vector<1x8x32xbf16>
    %c0_4 = arith.constant 0 : index
    %c0_5 = arith.constant 0 : index
    %c0_6 = arith.constant 0 : index
    %7 = vector.load %arg3[%c0_4, %c0_5, %c0_6] : memref<1x8x32xf32, #tpu.memory_space<vmem>>, vector<1x8x32xf32>
    %8 = vector.shape_cast %7 : vector<1x8x32xf32> to vector<8x32xf32>
    %9 = arith.truncf %8 : vector<8x32xf32> to vector<8x32xbf16>
    %c0_7 = arith.constant 0 : index
    %c0_8 = arith.constant 0 : index
    %10 = vector.load %arg5[%c0_7, %c0_8] : memref<32x64xbf16, #tpu.memory_space<vmem>>, vector<32x64xbf16>
    %cst_9 = arith.constant dense<0.000000e+00> : vector<8x64xf32>
    %11 = tpu.matmul %9, %10, %cst_9 {dimension_numbers = #tpu.dot_dimension_numbers<[1], [0], [0], [1], [0, 0, 1, 1], [], []>} : vector<8x32xbf16>, vector<32x64xbf16>, vector<8x64xf32> -> vector<8x64xf32>
    %12 = arith.truncf %11 : vector<8x64xf32> to vector<8x64xbf16>
    %13 = vector.shape_cast %12 : vector<8x64xbf16> to vector<1x8x64xbf16>
    %14 = vector.extract_strided_slice %6 {offsets = [0, 0, 0], sizes = [1, 8, 8], strides = [1, 1, 1]} : vector<1x8x32xbf16> to vector<1x8x8xbf16>
    %cst_10 = arith.constant 0xFF800000 : f32
    %15 = vector.broadcast %cst_10 : f32 to vector<1x8x1xf32>
    %cst_11 = arith.constant 0.000000e+00 : f32
    %16 = vector.broadcast %cst_11 : f32 to vector<1x8x1xf32>
    %cst_12 = arith.constant 0.000000e+00 : f32
    %17 = vector.broadcast %cst_12 : f32 to vector<1x8x8xf32>
    %18 = vector.extract_strided_slice %13 {offsets = [0, 0, 0], sizes = [1, 8, 8], strides = [1, 1, 1]} : vector<1x8x64xbf16> to vector<1x8x8xbf16>
    %19 = vector.extract_strided_slice %13 {offsets = [0, 0, 32], sizes = [1, 8, 8], strides = [1, 1, 1]} : vector<1x8x64xbf16> to vector<1x8x8xbf16>
    %cst_13 = arith.constant dense<0.000000e+00> : vector<1x8x8xf32>
    %20 = tpu.matmul %14, %18, %cst_13 {dimension_numbers = #tpu.dot_dimension_numbers<[2], [2], [1], [1], [0, 0, 0, 1, 1, 1], [0], [0]>} : vector<1x8x8xbf16>, vector<1x8x8xbf16>, vector<1x8x8xf32> -> vector<1x8x8xf32>
    %cst_14 = arith.constant dense<0xFF800000> : vector<1x8xf32>
    %21 = vector.multi_reduction <maximumf>, %20, %cst_14 [2] : vector<1x8x8xf32> to vector<1x8xf32>
    %22 = vector.shape_cast %21 : vector<1x8xf32> to vector<1x8x1xf32>
    %23 = arith.maximumf %15, %22 : vector<1x8x1xf32>
    %24 = arith.subf %15, %23 : vector<1x8x1xf32>
    %25 = math.exp %24 : vector<1x8x1xf32>
    %26 = vector.broadcast %23 : vector<1x8x1xf32> to vector<1x8x8xf32>
    %27 = arith.subf %20, %26 : vector<1x8x8xf32>
    %28 = math.exp %27 : vector<1x8x8xf32>
    %29 = arith.mulf %25, %16 : vector<1x8x1xf32>
    %cst_15 = arith.constant dense<0.000000e+00> : vector<1x8xf32>
    %30 = vector.multi_reduction <add>, %28, %cst_15 [2] : vector<1x8x8xf32> to vector<1x8xf32>
    %31 = vector.shape_cast %30 : vector<1x8xf32> to vector<1x8x1xf32>
    %32 = arith.addf %29, %31 : vector<1x8x1xf32>
    %33 = vector.broadcast %25 : vector<1x8x1xf32> to vector<1x8x8xf32>
    %34 = arith.mulf %33, %17 : vector<1x8x8xf32>
    %35 = arith.truncf %28 : vector<1x8x8xf32> to vector<1x8x8xbf16>
    %cst_16 = arith.constant dense<0.000000e+00> : vector<1x8x8xf32>
    %36 = tpu.matmul %35, %19, %cst_16 {dimension_numbers = #tpu.dot_dimension_numbers<[2], [1], [1], [2], [0, 0, 0, 1, 1, 2], [0], [0]>} : vector<1x8x8xbf16>, vector<1x8x8xbf16>, vector<1x8x8xf32> -> vector<1x8x8xf32>
    %37 = arith.addf %34, %36 : vector<1x8x8xf32>
    %38 = tpu.reciprocal %32 {approx = true} : vector<1x8x1xf32> -> vector<1x8x1xf32>
    %39 = vector.broadcast %38 : vector<1x8x1xf32> to vector<1x8x8xf32>
    %40 = arith.mulf %37, %39 : vector<1x8x8xf32>
    %41 = arith.truncf %40 : vector<1x8x8xf32> to vector<1x8x8xbf16>
    %42 = vector.extract_strided_slice %6 {offsets = [0, 0, 8], sizes = [1, 8, 8], strides = [1, 1, 1]} : vector<1x8x32xbf16> to vector<1x8x8xbf16>
    %cst_17 = arith.constant 0xFF800000 : f32
    %43 = vector.broadcast %cst_17 : f32 to vector<1x8x1xf32>
    %cst_18 = arith.constant 0.000000e+00 : f32
    %44 = vector.broadcast %cst_18 : f32 to vector<1x8x1xf32>
    %cst_19 = arith.constant 0.000000e+00 : f32
    %45 = vector.broadcast %cst_19 : f32 to vector<1x8x8xf32>
    %46 = vector.extract_strided_slice %13 {offsets = [0, 0, 8], sizes = [1, 8, 8], strides = [1, 1, 1]} : vector<1x8x64xbf16> to vector<1x8x8xbf16>
    %47 = vector.extract_strided_slice %13 {offsets = [0, 0, 40], sizes = [1, 8, 8], strides = [1, 1, 1]} : vector<1x8x64xbf16> to vector<1x8x8xbf16>
    %cst_20 = arith.constant dense<0.000000e+00> : vector<1x8x8xf32>
    %48 = tpu.matmul %42, %46, %cst_20 {dimension_numbers = #tpu.dot_dimension_numbers<[2], [2], [1], [1], [0, 0, 0, 1, 1, 1], [0], [0]>} : vector<1x8x8xbf16>, vector<1x8x8xbf16>, vector<1x8x8xf32> -> vector<1x8x8xf32>
    %cst_21 = arith.constant dense<0xFF800000> : vector<1x8xf32>
    %49 = vector.multi_reduction <maximumf>, %48, %cst_21 [2] : vector<1x8x8xf32> to vector<1x8xf32>
    %50 = vector.shape_cast %49 : vector<1x8xf32> to vector<1x8x1xf32>
    %51 = arith.maximumf %43, %50 : vector<1x8x1xf32>
    %52 = arith.subf %43, %51 : vector<1x8x1xf32>
    %53 = math.exp %52 : vector<1x8x1xf32>
    %54 = vector.broadcast %51 : vector<1x8x1xf32> to vector<1x8x8xf32>
    %55 = arith.subf %48, %54 : vector<1x8x8xf32>
    %56 = math.exp %55 : vector<1x8x8xf32>
    %57 = arith.mulf %53, %44 : vector<1x8x1xf32>
    %cst_22 = arith.constant dense<0.000000e+00> : vector<1x8xf32>
    %58 = vector.multi_reduction <add>, %56, %cst_22 [2] : vector<1x8x8xf32> to vector<1x8xf32>
    %59 = vector.shape_cast %58 : vector<1x8xf32> to vector<1x8x1xf32>
    %60 = arith.addf %57, %59 : vector<1x8x1xf32>
    %61 = vector.broadcast %53 : vector<1x8x1xf32> to vector<1x8x8xf32>
    %62 = arith.mulf %61, %45 : vector<1x8x8xf32>
    %63 = arith.truncf %56 : vector<1x8x8xf32> to vector<1x8x8xbf16>
    %cst_23 = arith.constant dense<0.000000e+00> : vector<1x8x8xf32>
    %64 = tpu.matmul %63, %47, %cst_23 {dimension_numbers = #tpu.dot_dimension_numbers<[2], [1], [1], [2], [0, 0, 0, 1, 1, 2], [0], [0]>} : vector<1x8x8xbf16>, vector<1x8x8xbf16>, vector<1x8x8xf32> -> vector<1x8x8xf32>
    %65 = arith.addf %62, %64 : vector<1x8x8xf32>
    %66 = tpu.reciprocal %60 {approx = true} : vector<1x8x1xf32> -> vector<1x8x1xf32>
    %67 = vector.broadcast %66 : vector<1x8x1xf32> to vector<1x8x8xf32>
    %68 = arith.mulf %65, %67 : vector<1x8x8xf32>
    %69 = arith.truncf %68 : vector<1x8x8xf32> to vector<1x8x8xbf16>
    %70 = vector.extract_strided_slice %6 {offsets = [0, 0, 16], sizes = [1, 8, 8], strides = [1, 1, 1]} : vector<1x8x32xbf16> to vector<1x8x8xbf16>
    %cst_24 = arith.constant 0xFF800000 : f32
    %71 = vector.broadcast %cst_24 : f32 to vector<1x8x1xf32>
    %cst_25 = arith.constant 0.000000e+00 : f32
    %72 = vector.broadcast %cst_25 : f32 to vector<1x8x1xf32>
    %cst_26 = arith.constant 0.000000e+00 : f32
    %73 = vector.broadcast %cst_26 : f32 to vector<1x8x8xf32>
    %74 = vector.extract_strided_slice %13 {offsets = [0, 0, 16], sizes = [1, 8, 8], strides = [1, 1, 1]} : vector<1x8x64xbf16> to vector<1x8x8xbf16>
    %75 = vector.extract_strided_slice %13 {offsets = [0, 0, 48], sizes = [1, 8, 8], strides = [1, 1, 1]} : vector<1x8x64xbf16> to vector<1x8x8xbf16>
    %cst_27 = arith.constant dense<0.000000e+00> : vector<1x8x8xf32>
    %76 = tpu.matmul %70, %74, %cst_27 {dimension_numbers = #tpu.dot_dimension_numbers<[2], [2], [1], [1], [0, 0, 0, 1, 1, 1], [0], [0]>} : vector<1x8x8xbf16>, vector<1x8x8xbf16>, vector<1x8x8xf32> -> vector<1x8x8xf32>
    %cst_28 = arith.constant dense<0xFF800000> : vector<1x8xf32>
    %77 = vector.multi_reduction <maximumf>, %76, %cst_28 [2] : vector<1x8x8xf32> to vector<1x8xf32>
    %78 = vector.shape_cast %77 : vector<1x8xf32> to vector<1x8x1xf32>
    %79 = arith.maximumf %71, %78 : vector<1x8x1xf32>
    %80 = arith.subf %71, %79 : vector<1x8x1xf32>
    %81 = math.exp %80 : vector<1x8x1xf32>
    %82 = vector.broadcast %79 : vector<1x8x1xf32> to vector<1x8x8xf32>
    %83 = arith.subf %76, %82 : vector<1x8x8xf32>
    %84 = math.exp %83 : vector<1x8x8xf32>
    %85 = arith.mulf %81, %72 : vector<1x8x1xf32>
    %cst_29 = arith.constant dense<0.000000e+00> : vector<1x8xf32>
    %86 = vector.multi_reduction <add>, %84, %cst_29 [2] : vector<1x8x8xf32> to vector<1x8xf32>
    %87 = vector.shape_cast %86 : vector<1x8xf32> to vector<1x8x1xf32>
    %88 = arith.addf %85, %87 : vector<1x8x1xf32>
    %89 = vector.broadcast %81 : vector<1x8x1xf32> to vector<1x8x8xf32>
    %90 = arith.mulf %89, %73 : vector<1x8x8xf32>
    %91 = arith.truncf %84 : vector<1x8x8xf32> to vector<1x8x8xbf16>
    %cst_30 = arith.constant dense<0.000000e+00> : vector<1x8x8xf32>
    %92 = tpu.matmul %91, %75, %cst_30 {dimension_numbers = #tpu.dot_dimension_numbers<[2], [1], [1], [2], [0, 0, 0, 1, 1, 2], [0], [0]>} : vector<1x8x8xbf16>, vector<1x8x8xbf16>, vector<1x8x8xf32> -> vector<1x8x8xf32>
    %93 = arith.addf %90, %92 : vector<1x8x8xf32>
    %94 = tpu.reciprocal %88 {approx = true} : vector<1x8x1xf32> -> vector<1x8x1xf32>
    %95 = vector.broadcast %94 : vector<1x8x1xf32> to vector<1x8x8xf32>
    %96 = arith.mulf %93, %95 : vector<1x8x8xf32>
    %97 = arith.truncf %96 : vector<1x8x8xf32> to vector<1x8x8xbf16>
    %98 = vector.extract_strided_slice %6 {offsets = [0, 0, 24], sizes = [1, 8, 8], strides = [1, 1, 1]} : vector<1x8x32xbf16> to vector<1x8x8xbf16>
    %cst_31 = arith.constant 0xFF800000 : f32
    %99 = vector.broadcast %cst_31 : f32 to vector<1x8x1xf32>
    %cst_32 = arith.constant 0.000000e+00 : f32
    %100 = vector.broadcast %cst_32 : f32 to vector<1x8x1xf32>
    %cst_33 = arith.constant 0.000000e+00 : f32
    %101 = vector.broadcast %cst_33 : f32 to vector<1x8x8xf32>
    %102 = vector.extract_strided_slice %13 {offsets = [0, 0, 24], sizes = [1, 8, 8], strides = [1, 1, 1]} : vector<1x8x64xbf16> to vector<1x8x8xbf16>
    %103 = vector.extract_strided_slice %13 {offsets = [0, 0, 56], sizes = [1, 8, 8], strides = [1, 1, 1]} : vector<1x8x64xbf16> to vector<1x8x8xbf16>
    %cst_34 = arith.constant dense<0.000000e+00> : vector<1x8x8xf32>
    %104 = tpu.matmul %98, %102, %cst_34 {dimension_numbers = #tpu.dot_dimension_numbers<[2], [2], [1], [1], [0, 0, 0, 1, 1, 1], [0], [0]>} : vector<1x8x8xbf16>, vector<1x8x8xbf16>, vector<1x8x8xf32> -> vector<1x8x8xf32>
    %cst_35 = arith.constant dense<0xFF800000> : vector<1x8xf32>
    %105 = vector.multi_reduction <maximumf>, %104, %cst_35 [2] : vector<1x8x8xf32> to vector<1x8xf32>
    %106 = vector.shape_cast %105 : vector<1x8xf32> to vector<1x8x1xf32>
    %107 = arith.maximumf %99, %106 : vector<1x8x1xf32>
    %108 = arith.subf %99, %107 : vector<1x8x1xf32>
    %109 = math.exp %108 : vector<1x8x1xf32>
    %110 = vector.broadcast %107 : vector<1x8x1xf32> to vector<1x8x8xf32>
    %111 = arith.subf %104, %110 : vector<1x8x8xf32>
    %112 = math.exp %111 : vector<1x8x8xf32>
    %113 = arith.mulf %109, %100 : vector<1x8x1xf32>
    %cst_36 = arith.constant dense<0.000000e+00> : vector<1x8xf32>
    %114 = vector.multi_reduction <add>, %112, %cst_36 [2] : vector<1x8x8xf32> to vector<1x8xf32>
    %115 = vector.shape_cast %114 : vector<1x8xf32> to vector<1x8x1xf32>
    %116 = arith.addf %113, %115 : vector<1x8x1xf32>
    %117 = vector.broadcast %109 : vector<1x8x1xf32> to vector<1x8x8xf32>
    %118 = arith.mulf %117, %101 : vector<1x8x8xf32>
    %119 = arith.truncf %112 : vector<1x8x8xf32> to vector<1x8x8xbf16>
    %cst_37 = arith.constant dense<0.000000e+00> : vector<1x8x8xf32>
    %120 = tpu.matmul %119, %103, %cst_37 {dimension_numbers = #tpu.dot_dimension_numbers<[2], [1], [1], [2], [0, 0, 0, 1, 1, 2], [0], [0]>} : vector<1x8x8xbf16>, vector<1x8x8xbf16>, vector<1x8x8xf32> -> vector<1x8x8xf32>
    %121 = arith.addf %118, %120 : vector<1x8x8xf32>
    %122 = tpu.reciprocal %116 {approx = true} : vector<1x8x1xf32> -> vector<1x8x1xf32>
    %123 = vector.broadcast %122 : vector<1x8x1xf32> to vector<1x8x8xf32>
    %124 = arith.mulf %121, %123 : vector<1x8x8xf32>
    %125 = arith.truncf %124 : vector<1x8x8xf32> to vector<1x8x8xbf16>
    %126 = tpu.concatenate %41, %69, %97, %125 in 2 : vector<1x8x8xbf16>, vector<1x8x8xbf16>, vector<1x8x8xbf16>, vector<1x8x8xbf16> -> vector<1x8x32xbf16>
    %127 = vector.shape_cast %126 : vector<1x8x32xbf16> to vector<8x32xbf16>
    %c0_38 = arith.constant 0 : index
    %c0_39 = arith.constant 0 : index
    %128 = vector.load %arg6[%c0_38, %c0_39] : memref<32x32xbf16, #tpu.memory_space<vmem>>, vector<32x32xbf16>
    %cst_40 = arith.constant dense<0.000000e+00> : vector<8x32xf32>
    %129 = tpu.matmul %127, %128, %cst_40 {dimension_numbers = #tpu.dot_dimension_numbers<[1], [0], [0], [1], [0, 0, 1, 1], [], []>} : vector<8x32xbf16>, vector<32x32xbf16>, vector<8x32xf32> -> vector<8x32xf32>
    %c0_41 = arith.constant 0 : index
    %c0_42 = arith.constant 0 : index
    %130 = vector.load %arg7[%c0_41, %c0_42] : memref<1x32xf32, #tpu.memory_space<vmem>>, vector<1x32xf32>
    %131 = vector.broadcast %130 : vector<1x32xf32> to vector<8x32xf32>
    %132 = arith.addf %129, %131 : vector<8x32xf32>
    %133 = vector.shape_cast %132 : vector<8x32xf32> to vector<1x8x32xf32>
    %c0_43 = arith.constant 0 : index
    %c0_44 = arith.constant 0 : index
    %c0_45 = arith.constant 0 : index
    %134 = vector.load %arg8[%c0_43, %c0_44, %c0_45] : memref<1x8x32xf32, #tpu.memory_space<vmem>>, vector<1x8x32xf32>
    tpu.vector_store %arg8[%c0_43, %c0_44, %c0_45], %133 {strides = array<i32>} : memref<1x8x32xf32, #tpu.memory_space<vmem>>, vector<1x8x32xf32>,
    return
  }
  func.func @transform_0(%arg0: i32, %arg1: i32) -> (i32, i32, i32) {
    %c0_i32 = arith.constant 0 : i32
    %c0_i32_0 = arith.constant 0 : i32
    return %arg0, %arg1, %c0_i32 : i32, i32, i32
  }
  func.func @transform_1(%arg0: i32, %arg1: i32) -> (i32, i32, i32) {
    %c0_i32 = arith.constant 0 : i32
    %c0_i32_0 = arith.constant 0 : i32
    %c0_i32_1 = arith.constant 0 : i32
    return %arg0, %c0_i32, %c0_i32_0 : i32, i32, i32
  }
  func.func @transform_2(%arg0: i32, %arg1: i32) -> (i32, i32) {
    %c0_i32 = arith.constant 0 : i32
    %c0_i32_0 = arith.constant 0 : i32
    %c0_i32_1 = arith.constant 0 : i32
    return %c0_i32, %c0_i32_0 : i32, i32
  }
  func.func @transform_3(%arg0: i32, %arg1: i32) -> (i32, i32) {
    %c0_i32 = arith.constant 0 : i32
    %c0_i32_0 = arith.constant 0 : i32
    %c0_i32_1 = arith.constant 0 : i32
    return %c0_i32, %c0_i32_0 : i32, i32
  }
  func.func @transform_4(%arg0: i32, %arg1: i32) -> (i32, i32) {
    %c0_i32 = arith.constant 0 : i32
    %c0_i32_0 = arith.constant 0 : i32
    %c0_i32_1 = arith.constant 0 : i32
    return %c0_i32, %c0_i32_0 : i32, i32
  }
  func.func @transform_5(%arg0: i32, %arg1: i32) -> (i32, i32) {
    %c0_i32 = arith.constant 0 : i32
    %c0_i32_0 = arith.constant 0 : i32
    %c0_i32_1 = arith.constant 0 : i32
    return %c0_i32, %c0_i32_0 : i32, i32
  }
  func.func @transform_6(%arg0: i32, %arg1: i32) -> (i32, i32, i32) {
    %c0_i32 = arith.constant 0 : i32
    %c0_i32_0 = arith.constant 0 : i32
    return %arg0, %arg1, %c0_i32 : i32, i32, i32
  }
}

</mosaic_0001>

<bundles_post_ra>
// kernel: tpu_custom_call.1
= control target key start
LH: loop header
LB: loop body
LE: loop exit
PB: predicated region body
PF: predicated region fallthrough
CT: control target
= control target key end

     0   :  { %s1622_s0 = inlined_call_operand.hbm [shape: f32[2,8,32], index: 0, kind: input, shape index: {}]   ;;  %s1623_s1 = inlined_call_operand.hbm [shape: f32[2,8,32], index: 1, kind: input, shape index: {}]   ;;  %s1624_s2 = inlined_call_operand.hbm [shape: bf16[32,32], index: 2, kind: input, shape index: {}]   ;;  %s1625_s3 = inlined_call_operand.hbm [shape: bf16[32,64], index: 3, kind: input, shape index: {}]   ;;  %s1626_s4 = inlined_call_operand.hbm [shape: bf16[32,32], index: 4, kind: input, shape index: {}]   ;;  %s1627_s5 = inlined_call_operand.vmem [shape: f32[1,32], index: 5, kind: input, shape index: {}]   ;;  %s1628_s6 = inlined_call_operand.hbm [shape: f32[2,8,32], index: 6, kind: output, shape index: {}]  }
   0x1   :  { %1632 = sst [smem:[#allocation21_spill]] %s1624_s2 }
   0x2   :  { %1633 = sst [smem:[#allocation22_spill]] %s1625_s3 }
   0x3   :  { %1634 = sst [smem:[#allocation23_spill]] %s1626_s4 }
   0x4   :  { %11 = vsyncpa [#allocation3], 0 }
   0x5   :  { %13 = vsyncpa [#allocation3 + $0x1], 0 }
   0x6   :  { %14 = vsyncpa [#allocation6], 0 }
   0x7   :  { %16 = vsyncpa [#allocation6 + $0x1], 0 }
   0x8   :  { %17 = vsyncpa [#allocation9], 0 }
   0x9   :  { %18 = vsyncpa [#allocation4], 0 }
   0xa   :  { %20 = vsyncpa [#allocation4 + $0x1], 0  ;;  %s1404_s21 = smov 0   ;;  %s1406_s22 = smov 0  }
   0xb   :  { %s1408_s23 = smov 0   ;;  %s1410_s24 = smov 0  }
   0xc   :  { %s1412_s25 = smov 0   ;;  %s1414_s26 = smov 0  }
   0xd LB: > { %1635 = sst [smem:[#allocation17_spill]] %s1340_s23  ;;  %s1435_s27 = sadd.s32 4294967295, %s1352_s26   ;;  %s1352_s26 = sphi %s1414_s26, %s26_s26   ;;  %s1348_s25 = sphi %s1412_s25, %s1651_s25   ;;  %s1344_s24 = sphi %s1410_s24, %s1650_s24   ;;  %s1340_s23 = sphi %s1408_s23, %s1649_s23   ;;  %s1336_s22 = sphi %s1406_s22, %s1653_s22   ;;  %s1332_s21 = sphi %s1404_s21, %s1652_s21  }
   0xe   : > { %1636 = sst [smem:[#allocation18_spill]] %s1348_s25  ;;  %p912_p0 = scmp.ge.s32.totalorder %s1352_s26, 1 }
   0xf   : > { %p61_p1 = scmp.eq.s32.totalorder %s1435_s27, 0  ;;  %p209_p2 = scmp.lt.s32.totalorder %s1352_s26, 3 }
  0x10   : > { %s1637_s2 = sld [smem:[#allocation21_spill]]  ;;  %s1354_s8 = smov [#allocation7]  }
  0x11   : > { %p1443_p3 = pnand %p912_p0, %p209_p2  ;;  %s222_s9 = sshll.u32 %s1354_s8, 4  ;;  %s223_s9 = int_to_ptr.vmem [resolvable:$true] %s222_s9 }
  0x12   : > { %p916_p6 = scmp.ge.s32.totalorder %s1352_s26, 2  ;;  %s1640_s3 = sld [smem:[#allocation22_spill]] }
  0x13   : > { %p991_p4 = pneg %p1443_p3  ;;  %s1355_s14 = smov 64  }
  0x14   : > { %s1356_s15 = smov 4   ;;  %s1357_s16 = smov [#allocation8]  }
  0x15   : > { %p1451_p5 = pnand %p991_p4, %p61_p1  ;;  %s236_s17 = sshll.u32 %s1357_s16, 4  ;;  %s237_s17 = int_to_ptr.vmem [resolvable:$true] %s236_s17 }
  0x16   : > { %s220_s30 = sshll.u32 %s1637_s2, 4  ;;  %s1641_s4 = sld [smem:[#allocation23_spill]]  ;;  %s221_s30 = int_to_ptr.hbm [resolvable:$true] %s220_s30 }
  0x17   : > { %994 = dma.hbm_to_vmem [thread:$0]  (!%p1451_p5), %s221_s30, 256, %s223_s9, [#allocation6], %s1355_s14, %s1355_s14, %s1356_s15  }
  0x18   : > { %s234_s13 = sshll.u32 %s1640_s3, 4  ;;  %s1358_s28 = smov [#allocation10]   ;;  %s235_s13 = int_to_ptr.hbm [resolvable:$true] %s234_s13 }
  0x19   : > { %997 = dma.hbm_to_vmem [thread:$0]  (!%p1451_p5), %s235_s13, 256, %s237_s17, [#allocation9], %s1355_s14, %s1355_s14, %s1356_s15  }
  0x1a   : > { %s250_s29 = sshll.u32 %s1358_s28, 4  ;;  %s911_s30 = sadd.s32 4294967294, %s1352_s26   ;;  %s251_s29 = int_to_ptr.vmem [resolvable:$true] %s250_s29 }
  0x1b   : > { %s38_s8 = sadd.s32 1, %s1348_s25  ;;  %s47_s9 = sadd.s32 1, %s1340_s23 }
  0x1c   : > { %s248_s20 = sshll.u32 %s1641_s4, 4  ;;  %p40_p7 = scmp.ge.s32.totalorder %s38_s8, 2  ;;  %s249_s20 = int_to_ptr.hbm [resolvable:$true] %s248_s20 }
  0x1d   : > { %1000 = dma.hbm_to_vmem [thread:$0]  (!%p1451_p5), %s249_s20, 256, %s251_s29, [#allocation9], %s1355_s14, %s1355_s14, %s1356_s15  }
  0x1e   : > { %p54_p8 = scmp.ne.s32.totalorder %s1340_s23, %s1336_s22  ;;  %p55_p9 = scmp.eq.s32.totalorder %s1352_s26, 0 }
  0x1f   : > { %p60_p10 = scmp.ne.s32.totalorder %s1336_s22, %s1332_s21  ;;  %s1655_s8 = smov (%p40_p7, %s38_s8), 0 }
  0x20   : > { %1642 = sst [smem:[#allocation19_spill]] %s1655_s8  ;;  %p1478_p11 = por %p55_p9, %p54_p8 }
  0x21   : > { %p1484_p12 = por %p61_p1, %p60_p10  ;;  %s42_s12 = ssub.s32 %s1348_s25, %s1655_s8 }
  0x22   : > { %p196_p13 = scmp.eq.s32.totalorder %s1435_s27, 1  ;;  %p45_p0 = scmp.eq.s32.totalorder %s42_s12, 0 }
  0x23   : > { %p202_p2 = scmp.eq.s32.totalorder %s911_s30, 1  ;;  %p1015_p5 = scmp.lt.s32.totalorder %s1352_s26, 2 }
  0x24   : > { %p1491_p4 = por %p196_p13, %p54_p8  ;;  %s267_s16 = sand.u32 1, %s1340_s23  }
  0x25   : > { %s1497_s14 = scalar_select %p45_p0, %s1340_s23, %s47_s9  }
  0x26   : > { %p1499_p7 = por %p202_p2, %p60_p10  ;;  %s917_s17 = sshll.u32 %s267_s16, 3 }
  0x27   : > { %1646 = sst [smem:[#allocation20_spill]] %s1497_s14  ;;  %s918_s18 = sshll.u32 %s1348_s25, 3 }
  0x28   : > { %s276_s28 = scalar_lea.hbm %s1622_s0, %s918_s18  ;;  %s271_s29 = scalar_lea.vmem [#allocation2], %s917_s17 }
  0x29   : > { %s280_s30 = sshll.u32 %s271_s29, 4  ;;  %s278_s12 = sshll.u32 %s276_s28, 4  ;;  %s281_s30 = int_to_ptr.vmem [resolvable:$true] %s280_s30  ;;  %s279_s12 = int_to_ptr.hbm [resolvable:$true] %s278_s12 }
  0x2a   : > { %p1002_p8 = pnand %p1015_p5, %p1478_p11  ;;  %s295_s3 = scalar_lea.hbm %s1623_s1, %s918_s18 }
  0x2b   : > { %s287_s4 = sand.u32 1, %s1352_s26   ;;  %s268_s8 = scalar_lea.sflag [#allocation3], %s267_s16 }
  0x2c   : > { %1004 = dma.hbm_to_vmem [thread:$0]  (!%p1002_p8), %s279_s12, 128, %s281_s30, %s268_s8  }
  0x2d   : > { %s297_s14 = sshll.u32 %s295_s3, 4  ;;  %s291_s25 = scalar_lea.vmem [#allocation5], %s917_s17  ;;  %s298_s14 = int_to_ptr.hbm [resolvable:$true] %s297_s14 }
  0x2e   : > { %s299_s23 = sshll.u32 %s291_s25, 4  ;;  %s288_s19 = scalar_lea.sflag [#allocation6], %s287_s4  ;;  %s300_s23 = int_to_ptr.vmem [resolvable:$true] %s299_s23 }
  0x2f   : > { %1007 = dma.hbm_to_vmem [thread:$0]  (!%p1002_p8), %s298_s14, 128, %s300_s23, %s288_s19  }
  0x30   : > { %308 = sbr.rel (%p1443_p3) target bundleno = 1161 (0x489), region = 44  ;;  %s1517_s11 = sand.u32 (!%p1443_p3), 1, %s1336_s22  }
  0x31   : > { %s1520_s2 = sshll.u32 (!%p1443_p3), %s1517_s11, 3  ;;  %s311_s8 = scalar_lea.sflag (!%p1443_p3), [#allocation3], %s1517_s11 }
  0x32   : > { %s314_s3 = scalar_lea.vmem (!%p1443_p3), [#allocation2], %s1520_s2 }
  0x35   : > { %1311 = dma.done.wait (%p1484_p12), %s311_s8, 128  }
  0x36   : > { %1313 = vsyncadd (%p1484_p12), %s311_s8, 4294967168  ;;  %s320_s4 = sand.u32 1, %s1435_s27   ;;  %s324_s25 = scalar_lea.vmem [#allocation5], %s1520_s2 }
  0x37   : > { %s321_s23 = scalar_lea.sflag [#allocation6], %s320_s4 }
  0x38   : > { %1315 = dma.done.wait (%p1484_p12), %s321_s23, 128  }
  0x39   : > { %1317 = vsyncadd (%p1484_p12), %s321_s23, 4294967168 }
  0x3a   : > { %1319 = dma.done.wait (%p61_p1), [#allocation6], 256  }
  0x3b   : > { %1321 = vsyncadd (%p61_p1), [#allocation6], 4294967040 }
  0x3c   : > { %1323 = dma.done.wait (%p61_p1), [#allocation9], 512  }
  0x3d   : > { %1325 = vsyncadd (%p61_p1), [#allocation9], 4294966784  ;;  %v968_v0 = vld [vmem:[#allocation7 + $0x8] sm:$0xff]  ;;  %v970_v1 = vld [vmem:[#allocation8 + $0x8] sm:$0xff]  ;;  %vm393_vm0 = vcmask 261120   ;;  %vm446_vm1 = vcmask 64512  }
  0x3e   : > { %v967_v2 = vld [vmem:[#allocation7] sm:$0xff]  ;;  %v969_v3 = vld [vmem:[#allocation8] sm:$0xff]  ;;  %403 = vmatpush.bf16.msra.mxu0 %v968_v0  ;;  %438 = vmatpush.bf16.msra.mxu1 %v970_v1  ;;  %s1359_s27 = smov 112   ;;  %s1360_s7 = smov 120   ;;  %vm489_vm2 = vcmask 1043456   ;;  %vm720_vm3 = vcmask 130048  }
  0x3f   : > { %v375_v4 = vld [vmem:[%s314_s3] sm:$0xff]  ;;  %v411_v5 = vld [vmem:[%s324_s25] sm:$0xff]  ;;  %s1361_s10 = smov 104   ;;  %s1362_s14 = smov 96   ;;  %vm723_vm4 = vcmask 195584  }
  0x40   : > { %v376_v6 = vpack.c.bf16 %v375_v4, %v375_v4  ;;  %v412_v7 = vpack.c.bf16 %v411_v5, %v411_v5  ;;  %s1363_s16 = smov 88   ;;  %s1364_s17 = smov 80  }
  0x41   : > { %s1365_s18 = smov 72   ;;  %s1366_s20 = smov 16  }
  0x42   : > { %404 = vmatpush.bf16.msra.mxu0 %v967_v2  ;;  %439 = vmatpush.bf16.msra.mxu1 %v969_v3  ;;  %s1367_s28 = smov 8   ;;  %s1368_s29 = smov 24  }
  0x43   : > { %s964_s30 = sshll.u32 %s1344_s24, 3  ;;  %s373_s4 = scalar_lea.vmem [#allocation11], %s1520_s2 }
  0x44   : > { %s774_s19 = scalar_lea.hbm %s1628_s6, %s964_s30  ;;  %s776_s23 = sshll.u32 %s373_s4, 4  ;;  %s777_s23 = int_to_ptr.vmem [resolvable:$true] %s776_s23 }
  0x45   : > { %936 = vmatmul.msk.bf16.vlgmr.msra.gmra.mxu0 %vm393_vm0, %v376_v6  ;;  %945 = vmatmul.msk.bf16.vlgmr.msra.gmra.mxu1 %vm393_vm0, %v412_v7  ;;  %s778_s25 = sshll.u32 %s774_s19, 4  ;;  %s1278_s2 = scalar_lea.hbm %s1628_s6, 16  ;;  %s779_s25 = int_to_ptr.hbm [resolvable:$true] %s778_s25 }
  0x46   : > { %s1272_s24 = sshra.s32 %s779_s25, 4  ;;  %s1273_s24 = int_to_ptr.hbm [resolvable:$true] %s1272_s24 }
  0x47   : > { %p1279_p10 = scmp.lt.s32.totalorder %s1273_s24, %s1628_s6 }
  0xc2   : > { %v406_v8 = vpop.f32.mrf.mxu0  ;;  %v441_v9 = vpop.f32.mrf.mxu1 }
  0xc3   : > { %v445_v10 = vpack.c.bf16 %v441_v9, %v441_v9  ;;  %v410_v11 = vpack.c.bf16 %v406_v8, %v406_v8 }
  0xc5   : > { %v482_v12 = vunpack.c.l.b16 %v445_v10  ;;  %v451_v13 = vsel %vm446_vm1, %v445_v10, 0  ;;  %v511_v15 = vunpack.c.l.b16 %v410_v11 }
  0xc6   : > { %460 = vmatpush.bf16.xpose.msra.mxu2 %v451_v13 }
  0xc7   : > { %v1545_v14 = vpack.c.b16 %v482_v12, %v482_v12  ;;  %v512_v18 = vpack.c.b16 %v511_v15, %v511_v15 }
  0xc9   : > { %578 = vrot.lane.b32.xlu2 %v1545_v14, %s1359_s27  ;;  %515 = vrot.lane.b32.xlu1 %v1545_v14, %s1360_s7 }
  0xca   : > { %v408_v16 = vpop.f32.mrf.mxu0  ;;  %v443_v17 = vpop.f32.mrf.mxu1 }
  0xcd   : > { %946 = vmatmul.msk.bf16.vlgmr.msra.gmra.mxu2 %vm446_vm1, %v410_v11 }
  0xd1   : > { %641 = vrot.lane.b32.xlu2 %v1545_v14, %s1361_s10  ;;  %513 = vrot.lane.b32.xlu1 %v512_v18, %s1360_s7  ;;  %s1274_s7 = scalar_lea.hbm %s1273_s24, 8 }
  0xd2   : > { %p1275_p1 = scmp.ne.s32.totalorder %s1273_s24, %s1274_s7  ;;  %p1280_p11 = scmp.lt.s32.totalorder %s1278_s2, %s1274_s7 }
  0xd4   : > { %p1276_p3 = pnand %p1275_p1, %p1491_p4  ;;  %p1281_p12 = por %p1280_p11, %p1279_p10 }
  0xd6   : > { %p1277_p9 = pneg %p1276_p3 }
  0xd8   : > { %p1282_p13 = pnand %p1281_p12, %p1277_p9 }
  0xd9   : > { %639 = vrot.lane.b32.xlu2 %v512_v18, %s1361_s10  ;;  %576 = vrot.lane.b32.xlu1 %v512_v18, %s1359_s27  ;;  %s763_s27 = scalar_lea.sflag [#allocation4], %s1517_s11 }
 0x123   : > { %v579_v19 = vpop.permute.xlu2 %578 }
 0x124   : > { %v584_v20 = vsel %vm446_vm1, %v579_v19, 0 }
 0x125   : > { %593 = vmatpush.bf16.xpose.msrb.mxu1 %v584_v20 }
 0x12b   : > { %v642_v36 = vpop.permute.xlu2 %641 }
 0x12c   : > { %v647_v39 = vsel %vm446_vm1, %v642_v36, 0 }
 0x133   : > { %v640_v42 = vpop.permute.xlu2 %639 }
 0x13b   : > { %v516_v21 = vpop.permute.xlu1 %515 }
 0x13c   : > { %v521_v37 = vsel %vm446_vm1, %v516_v21, 0 }
 0x143   : > { %v514_v22 = vpop.permute.xlu1 %513 }
 0x14b   : > { %v577_v23 = vpop.permute.xlu1 %576 }
 0x14c   : > { %950 = vmatmul.msk.bf16.vlgmr.msrb.gmra.mxu1 %vm446_vm1, %v577_v23 }
 0x150   : > { %v462_v24 = vpop.f32.mrf.mxu2 }
 0x151   : > { %v466_v25 = vsel %vm446_vm1, %v462_v24, -inf }
 0x152   : > { %467 = vmax.xlane.f32.xlu0 %v466_v25 }
 0x158   : > { %v464_v26 = vpop.f32.mrf.mxu2 }
 0x166   : > { %484 = vrot.lane.b32.xlu0 %v1545_v14, %s1362_s14 }
 0x16e   : > { %551 = vrot.lane.b32.xlu0 %v1545_v14, %s1363_s16 }
 0x1c5   : > { %v468_v27 = vpop.xlane.xlu0 %467 }
 0x1c6   : > { %v472_v29 = vsub.f32 %v462_v24, %v468_v27  ;;  %v469_v50 = vsub.f32 -inf, %v468_v27 }
 0x1c8   : > { %v473_v31 = vmul.f32 1.442695, %v472_v29  ;;  %v470_v51 = vmul.f32 1.442695, %v469_v50 }
 0x1c9   : > { %v595_v28 = vpop.f32.mrf.mxu1 }
 0x1ca   : > { %v599_v30 = vsel %vm446_vm1, %v595_v28, -inf  ;;  %1084 = vpow2.f32 %v473_v31 }
 0x1cb   : > { %600 = vmax.xlane.f32.xlu2 %v599_v30 }
 0x1d0   : > { %v1085_v33 = vpop.eup %1084 }
 0x1d1   : > { %v597_v32 = vpop.f32.mrf.mxu1  ;;  %v480_v38 = vpack.c.bf16 %v1085_v33, %v1085_v33  ;;  %v476_v63 = vsel %vm446_vm1, %v1085_v33, 0.0 }
 0x1d8   : > { %v485_v34 = vpop.permute.xlu0 %484 }
 0x1d9   : > { %v491_v35 = vsel %vm489_vm2, %v485_v34, 0 }
 0x1da   : > { %500 = vmatpush.bf16.msra.mxu3 %v491_v35 }
 0x1dd   : > { %947 = vmatmul.msk.bf16.vlgmr.msra.gmra.mxu3 %vm446_vm1, %v480_v38 }
 0x1de   : > { %530 = vmatpush.bf16.xpose.msrb.mxu3 %v521_v37 }
 0x1e0   : > { %v552_v40 = vpop.permute.xlu0 %551 }
 0x1e1   : > { %v557_v41 = vsel %vm489_vm2, %v552_v40, 0 }
 0x1e2   : > { %566 = vmatpush.bf16.msrb.mxu0 %v557_v41 }
 0x1e3   : > { %614 = vrot.lane.b32.xlu2 %v1545_v14, %s1364_s17 }
 0x1e6   : > { %656 = vmatpush.bf16.xpose.msra.mxu3 %v647_v39 }
 0x1ed   : > { %948 = vmatmul.msk.bf16.vlgmr.msrb.gmra.mxu3 %vm446_vm1, %v514_v22 }
 0x1fd   : > { %952 = vmatmul.msk.bf16.vlgmr.msra.gmra.mxu3 %vm446_vm1, %v640_v42 }
 0x23e   : > { %v601_v43 = vpop.xlane.xlu2 %600 }
 0x23f   : > { %v605_v44 = vsub.f32 %v595_v28, %v601_v43  ;;  %v602_v0 = vsub.f32 -inf, %v601_v43 }
 0x241   : > { %v606_v45 = vmul.f32 1.442695, %v605_v44  ;;  %v603_v1 = vmul.f32 1.442695, %v602_v0 }
 0x243   : > { %1086 = vpow2.f32 %v606_v45 }
 0x244   : > { %1088 = vpow2.f32 %v470_v51 }
 0x245   : > { %1090 = vpow2.f32 %v603_v1 }
 0x246   : > { %v615_v46 = vpop.permute.xlu2 %614 }
 0x247   : > { %v620_v47 = vsel %vm489_vm2, %v615_v46, 0 }
 0x248   : > { %629 = vmatpush.bf16.msrb.mxu2 %v620_v47 }
 0x249   : > { %v1087_v48 = vpop.eup %1086 }
 0x24a   : > { %v613_v49 = vpack.c.bf16 %v1087_v48, %v1087_v48  ;;  %v1089_v52 = vpop.eup %1088  ;;  %v609_v16 = vsel %vm446_vm1, %v1087_v48, 0.0 }
 0x24b   : > { %v475_v53 = vmul.f32 0.0, %v1089_v52  ;;  %v1091_v2 = vpop.eup %1090 }
 0x24c   : > { %951 = vmatmul.msk.bf16.vlgmr.msrb.gmra.mxu2 %vm446_vm1, %v613_v49  ;;  %v608_v3 = vmul.f32 0.0, %v1091_v2 }
 0x260   : > { %v502_v54 = vpop.f32.mrf.mxu3 }
 0x261   : > { %v506_v55 = vadd.f32 %v502_v54, %v475_v53 }
 0x268   : > { %v504_v56 = vpop.f32.mrf.mxu3 }
 0x270   : > { %v532_v57 = vpop.f32.mrf.mxu3 }
 0x271   : > { %v536_v58 = vsel %vm446_vm1, %v532_v57, -inf }
 0x272   : > { %537 = vmax.xlane.f32.xlu1 %v536_v58 }
 0x278   : > { %v534_v59 = vpop.f32.mrf.mxu3 }
 0x280   : > { %v658_v60 = vpop.f32.mrf.mxu3 }
 0x281   : > { %v662_v61 = vsel %vm446_vm1, %v658_v60, -inf }
 0x282   : > { %663 = vmax.xlane.f32.xlu0 %v662_v61  ;;  %v972_v61 = vld [vmem:[#allocation10 + $0x8] sm:$0xff] }
 0x283   : > { %754 = vmatpush.bf16.msra.mxu1 %v972_v61 }
 0x288   : > { %v660_v62 = vpop.f32.mrf.mxu3 }
 0x289   : > { %v971_v62 = vld [vmem:[#allocation10] sm:$0xff] }
 0x28a   : > { %755 = vmatpush.bf16.msra.mxu1 %v971_v62 }
 0x28b   : > { %677 = vrot.lane.b32.xlu1 %v1545_v14, %s1365_s18 }
 0x2b5   : > { %477 = vadd.xlane.f32.xlu1 %v476_v63 }
 0x2cf   : > { %v631_v4 = vpop.f32.mrf.mxu2 }
 0x2d0   : > { %v635_v5 = vadd.f32 %v631_v4, %v608_v3 }
 0x2d7   : > { %v633_v6 = vpop.f32.mrf.mxu2 }
 0x2d8   : > { %v1083_v6 = vld [vmem:[%s1627_s5] ss:$0 sm:$0xff] }
 0x2e5   : > { %v538_v7 = vpop.xlane.xlu1 %537 }
 0x2e6   : > { %v542_v8 = vsub.f32 %v532_v57, %v538_v7  ;;  %v539_v26 = vsub.f32 -inf, %v538_v7 }
 0x2e8   : > { %v543_v9 = vmul.f32 1.442695, %v542_v8  ;;  %v540_v27 = vmul.f32 1.442695, %v539_v26 }
 0x2ea   : > { %1092 = vpow2.f32 %v543_v9 }
 0x2f0   : > { %v1093_v10 = vpop.eup %1092 }
 0x2f1   : > { %v546_v11 = vsel %vm446_vm1, %v1093_v10, 0.0  ;;  %v550_v12 = vpack.c.bf16 %v1093_v10, %v1093_v10 }
 0x2f2   : > { %547 = vadd.xlane.f32.xlu0 %v546_v11 }
 0x2f3   : > { %949 = vmatmul.msk.bf16.vlgmr.msrb.gmra.mxu0 %vm446_vm1, %v550_v12 }
 0x2f5   : > { %v664_v13 = vpop.xlane.xlu0 %663 }
 0x2f6   : > { %v668_v14 = vsub.f32 %v658_v60, %v664_v13  ;;  %v665_v28 = vsub.f32 -inf, %v664_v13 }
 0x2f8   : > { %v669_v15 = vmul.f32 1.442695, %v668_v14  ;;  %v666_v31 = vmul.f32 1.442695, %v665_v28 }
 0x2fa   : > { %1094 = vpow2.f32 %v669_v15  ;;  %610 = vadd.xlane.f32.xlu0 %v609_v16 }
 0x2fd   : > { %v678_v17 = vpop.permute.xlu1 %677 }
 0x2fe   : > { %v683_v18 = vsel %vm489_vm2, %v678_v17, 0 }
 0x2ff   : > { %692 = vmatpush.bf16.msra.mxu0 %v683_v18 }
 0x300   : > { %v1095_v19 = vpop.eup %1094 }
 0x301   : > { %v676_v20 = vpack.c.bf16 %v1095_v19, %v1095_v19  ;;  %v672_v21 = vsel %vm446_vm1, %v1095_v19, 0.0 }
 0x302   : > { %673 = vadd.xlane.f32.xlu2 %v672_v21 }
 0x303   : > { %953 = vmatmul.msk.bf16.vlgmr.msra.gmra.mxu0 %vm446_vm1, %v676_v20 }
 0x328   : > { %v478_v22 = vpop.xlane.xlu1 %477 }
 0x329   : > { %v479_v23 = vadd.f32 %v478_v22, %v475_v53 }
 0x32b   : > { %1096 = vrcp.f32 %v479_v23 }
 0x32c   : > { %1098 = vpow2.f32 %v540_v27 }
 0x32d   : > { %1100 = vpow2.f32 %v666_v31 }
 0x331   : > { %v1097_v24 = vpop.eup %1096 }
 0x332   : > { %v508_v25 = vmul.f32 %v1097_v24, %v506_v55  ;;  %v1099_v30 = vpop.eup %1098 }
 0x333   : > { %v545_v32 = vmul.f32 0.0, %v1099_v30  ;;  %v1101_v37 = vpop.eup %1100 }
 0x334   : > { %v671_v41 = vmul.f32 0.0, %v1101_v37  ;;  %v509_v1 = vpack.c.bf16 %v508_v25, %v508_v25 }
 0x365   : > { %v548_v29 = vpop.xlane.xlu0 %547 }
 0x366   : > { %v549_v34 = vadd.f32 %v548_v29, %v545_v32 }
 0x36d   : > { %v611_v33 = vpop.xlane.xlu0 %610 }
 0x36e   : > { %v612_v35 = vadd.f32 %v611_v33, %v608_v3 }
 0x370   : > { %1102 = vrcp.f32 %v612_v35  ;;  %v568_v36 = vpop.f32.mrf.mxu0 }
 0x371   : > { %1104 = vrcp.f32 %v549_v34  ;;  %v572_v38 = vadd.f32 %v568_v36, %v545_v32 }
 0x375   : > { %v674_v39 = vpop.xlane.xlu2 %673 }
 0x376   : > { %v1103_v40 = vpop.eup %1102  ;;  %v675_v44 = vadd.f32 %v674_v39, %v671_v41 }
 0x377   : > { %v637_v42 = vmul.f32 %v1103_v40, %v635_v5  ;;  %v1105_v43 = vpop.eup %1104 }
 0x378   : > { %v570_v45 = vpop.f32.mrf.mxu0  ;;  %v574_v46 = vmul.f32 %v1105_v43, %v572_v38  ;;  %1106 = vrcp.f32 %v675_v44 }
 0x379   : > { %v638_v47 = vpack.c.bf16 %v637_v42, %v637_v42 }
 0x37a   : > { %v575_v49 = vpack.c.bf16 %v574_v46, %v574_v46 }
 0x37b   : > { %v708_v48 = vunpack.c.l.b16 %v638_v47 }
 0x37c   : > { %v703_v52 = vunpack.c.l.b16 %v575_v49 }
 0x37d   : > { %v709_v50 = vpack.c.b16 %v708_v48, %v708_v48 }
 0x37e   : > { %v1107_v54 = vpop.eup %1106  ;;  %v704_v57 = vpack.c.b16 %v703_v52, %v703_v52 }
 0x37f   : > { %710 = vrot.lane.b32.xlu0 %v709_v50, %s1366_s20 }
 0x380   : > { %v694_v51 = vpop.f32.mrf.mxu0 }
 0x381   : > { %v698_v53 = vadd.f32 %v694_v51, %v671_v41 }
 0x383   : > { %v700_v55 = vmul.f32 %v1107_v54, %v698_v53 }
 0x385   : > { %v701_v56 = vpack.c.bf16 %v700_v55, %v700_v55 }
 0x387   : > { %705 = vrot.lane.b32.xlu0 %v704_v57, %s1367_s28  ;;  %v713_v59 = vunpack.c.l.b16 %v701_v56 }
 0x388   : > { %v696_v58 = vpop.f32.mrf.mxu0 }
 0x389   : > { %v714_v60 = vpack.c.b16 %v713_v59, %v713_v59 }
 0x38f   : > { %715 = vrot.lane.b32.xlu0 %v714_v60, %s1368_s29 }
 0x3f1   : > { %v711_v63 = vpop.permute.xlu0 %710 }
 0x3f9   : > { %v706_v0 = vpop.permute.xlu0 %705 }
 0x3fa   : > { %v719_v2 = vsel %vm446_vm1, %v509_v1, %v706_v0 }
 0x3fb   : > { %v722_v3 = vsel %vm720_vm3, %v719_v2, %v711_v63 }
 0x401   : > { %v716_v4 = vpop.permute.xlu0 %715 }
 0x402   : > { %v725_v5 = vsel %vm723_vm4, %v722_v3, %v716_v4 }
 0x403   : > { %962 = vmatmul.msk.bf16.vlgmr.msra.gmra.mxu1 %vm393_vm0, %v725_v5 }
 0x480   : > { %v757_v7 = vpop.f32.mrf.mxu1 }
 0x481   : > { %v758_v8 = vadd.f32 %v1083_v6, %v757_v7 }
 0x483   : > { %761 = vst.msk [vmem:[%s373_s4] sm:$0xff] %vm393_vm0, %v758_v8 }
 0x484   : > { %1285 = shalt.err (!%p1282_p13)
}
 0x485   : > { %989 = dma.vmem_to_hbm [thread:$0]  (%p1491_p4), %s777_s23, 128, %s779_s25, %s763_s27  }
 0x488   : > { %v759_v9 = vpop.f32.mrf.mxu1 }
 0x489 PF: > { %s790_s11 = sand.u32 1, %s1332_s21   ;;  %p1009_p0 = pnand %p916_p6, %p1499_p7 }
 0x48a   : > { %s791_s18 = scalar_lea.sflag [#allocation4], %s790_s11 }
 0x48b   : > { %p1010_p2 = pneg %p1009_p0 }
 0x48d   : > { %1327 = dma.done.wait (%p1010_p2), %s791_s18, 128  }
 0x48e   : > { %1329 = vsyncadd (%p1010_p2), %s791_s18, 4294967168  ;;  %s26_s26 = sadd.s32 1, %s1352_s26   ;;  %s1648_s20 = sld [smem:[#allocation17_spill]] }
 0x48f   : > { %p23_p5 = scmp.ge.s32.totalorder %s26_s26, 4   ;;  %s1649_s23 = sld [smem:[#allocation20_spill]] }
 0x490   : > { %s1650_s24 = sld [smem:[#allocation18_spill]]  ;;  %s1652_s21 = smov %s1336_s22 }
 0x491   : > { %s1651_s25 = sld [smem:[#allocation19_spill]]  ;;  %25 = sbr.rel (!%p23_p5) target bundleno = 13 (0xd), region = 114 }
 0x494   : > { %s1653_s22 = smov %s1648_s20 }
 0x496   :  { %797 = vsyncpa [#allocation3], 1 }
 0x497   :  { %799 = vsyncpa [#allocation3 + $0x1], 1 }
 0x498   :  { %800 = vsyncpa [#allocation6], 1 }
 0x499   :  { %802 = vsyncpa [#allocation6 + $0x1], 1 }
 0x49a   :  { %803 = vsyncpa [#allocation9], 1 }
 0x49b   :  { %804 = vsyncpa [#allocation4], 1 }
 0x49c   :  { %806 = vsyncpa [#allocation4 + $0x1], 1 }

// kernel: tpu_custom_call.1
= control target key start
LH: loop header
LB: loop body
LE: loop exit
PB: predicated region body
PF: predicated region fallthrough
CT: control target
= control target key end

     0   :  { %s1622_s0 = inlined_call_operand.hbm [shape: f32[2,8,32], index: 0, kind: input, shape index: {}]   ;;  %s1623_s1 = inlined_call_operand.hbm [shape: f32[2,8,32], index: 1, kind: input, shape index: {}]   ;;  %s1624_s2 = inlined_call_operand.hbm [shape: bf16[32,32], index: 2, kind: input, shape index: {}]   ;;  %s1625_s3 = inlined_call_operand.hbm [shape: bf16[32,64], index: 3, kind: input, shape index: {}]   ;;  %s1626_s4 = inlined_call_operand.hbm [shape: bf16[32,32], index: 4, kind: input, shape index: {}]   ;;  %s1627_s5 = inlined_call_operand.vmem [shape: f32[1,32], index: 5, kind: input, shape index: {}]   ;;  %s1628_s6 = inlined_call_operand.hbm [shape: f32[2,8,32], index: 6, kind: output, shape index: {}]  }
   0x1   :  { %1632 = sst [smem:[#allocation21_spill]] %s1624_s2 }
   0x2   :  { %1633 = sst [smem:[#allocation22_spill]] %s1625_s3 }
   0x3   :  { %1634 = sst [smem:[#allocation23_spill]] %s1626_s4 }
   0x4   :  { %11 = vsyncpa [#allocation3], 0 }
   0x5   :  { %13 = vsyncpa [#allocation3 + $0x1], 0 }
   0x6   :  { %14 = vsyncpa [#allocation6], 0 }
   0x7   :  { %16 = vsyncpa [#allocation6 + $0x1], 0 }
   0x8   :  { %17 = vsyncpa [#allocation9], 0 }
   0x9   :  { %18 = vsyncpa [#allocation4], 0 }
   0xa   :  { %20 = vsyncpa [#allocation4 + $0x1], 0  ;;  %s1404_s21 = smov 0   ;;  %s1406_s22 = smov 0  }
   0xb   :  { %s1408_s23 = smov 0   ;;  %s1410_s24 = smov 0  }
   0xc   :  { %s1412_s25 = smov 0   ;;  %s1414_s26 = smov 0  }
   0xd LB: > { %1635 = sst [smem:[#allocation17_spill]] %s1340_s23  ;;  %s1435_s27 = sadd.s32 4294967295, %s1352_s26   ;;  %s1352_s26 = sphi %s1414_s26, %s26_s26   ;;  %s1348_s25 = sphi %s1412_s25, %s1651_s25   ;;  %s1344_s24 = sphi %s1410_s24, %s1650_s24   ;;  %s1340_s23 = sphi %s1408_s23, %s1649_s23   ;;  %s1336_s22 = sphi %s1406_s22, %s1653_s22   ;;  %s1332_s21 = sphi %s1404_s21, %s1652_s21  }
   0xe   : > { %1636 = sst [smem:[#allocation18_spill]] %s1348_s25  ;;  %p912_p0 = scmp.ge.s32.totalorder %s1352_s26, 1 }
   0xf   : > { %p61_p1 = scmp.eq.s32.totalorder %s1435_s27, 0  ;;  %p209_p2 = scmp.lt.s32.totalorder %s1352_s26, 3 }
  0x10   : > { %s1637_s2 = sld [smem:[#allocation21_spill]]  ;;  %s1354_s8 = smov [#allocation7]  }
  0x11   : > { %p1443_p3 = pnand %p912_p0, %p209_p2  ;;  %s222_s9 = sshll.u32 %s1354_s8, 4  ;;  %s223_s9 = int_to_ptr.vmem [resolvable:$true] %s222_s9 }
  0x12   : > { %p916_p6 = scmp.ge.s32.totalorder %s1352_s26, 2  ;;  %s1640_s3 = sld [smem:[#allocation22_spill]] }
  0x13   : > { %p991_p4 = pneg %p1443_p3  ;;  %s1355_s14 = smov 64  }
  0x14   : > { %s1356_s15 = smov 4   ;;  %s1357_s16 = smov [#allocation8]  }
  0x15   : > { %p1451_p5 = pnand %p991_p4, %p61_p1  ;;  %s236_s17 = sshll.u32 %s1357_s16, 4  ;;  %s237_s17 = int_to_ptr.vmem [resolvable:$true] %s236_s17 }
  0x16   : > { %s220_s30 = sshll.u32 %s1637_s2, 4  ;;  %s1641_s4 = sld [smem:[#allocation23_spill]]  ;;  %s221_s30 = int_to_ptr.hbm [resolvable:$true] %s220_s30 }
  0x17   : > { %994 = dma.hbm_to_vmem [thread:$0]  (!%p1451_p5), %s221_s30, 256, %s223_s9, [#allocation6], %s1355_s14, %s1355_s14, %s1356_s15  }
  0x18   : > { %s234_s13 = sshll.u32 %s1640_s3, 4  ;;  %s1358_s28 = smov [#allocation10]   ;;  %s235_s13 = int_to_ptr.hbm [resolvable:$true] %s234_s13 }
  0x19   : > { %997 = dma.hbm_to_vmem [thread:$0]  (!%p1451_p5), %s235_s13, 256, %s237_s17, [#allocation9], %s1355_s14, %s1355_s14, %s1356_s15  }
  0x1a   : > { %s250_s29 = sshll.u32 %s1358_s28, 4  ;;  %s911_s30 = sadd.s32 4294967294, %s1352_s26   ;;  %s251_s29 = int_to_ptr.vmem [resolvable:$true] %s250_s29 }
  0x1b   : > { %s38_s8 = sadd.s32 1, %s1348_s25  ;;  %s47_s9 = sadd.s32 1, %s1340_s23 }
  0x1c   : > { %s248_s20 = sshll.u32 %s1641_s4, 4  ;;  %p40_p7 = scmp.ge.s32.totalorder %s38_s8, 2  ;;  %s249_s20 = int_to_ptr.hbm [resolvable:$true] %s248_s20 }
  0x1d   : > { %1000 = dma.hbm_to_vmem [thread:$0]  (!%p1451_p5), %s249_s20, 256, %s251_s29, [#allocation9], %s1355_s14, %s1355_s14, %s1356_s15  }
  0x1e   : > { %p54_p8 = scmp.ne.s32.totalorder %s1340_s23, %s1336_s22  ;;  %p55_p9 = scmp.eq.s32.totalorder %s1352_s26, 0 }
  0x1f   : > { %p60_p10 = scmp.ne.s32.totalorder %s1336_s22, %s1332_s21  ;;  %s1655_s8 = smov (%p40_p7, %s38_s8), 0 }
  0x20   : > { %1642 = sst [smem:[#allocation19_spill]] %s1655_s8  ;;  %p1478_p11 = por %p55_p9, %p54_p8 }
  0x21   : > { %p1484_p12 = por %p61_p1, %p60_p10  ;;  %s42_s12 = ssub.s32 %s1348_s25, %s1655_s8 }
  0x22   : > { %p196_p13 = scmp.eq.s32.totalorder %s1435_s27, 1  ;;  %p45_p0 = scmp.eq.s32.totalorder %s42_s12, 0 }
  0x23   : > { %p202_p2 = scmp.eq.s32.totalorder %s911_s30, 1  ;;  %p1015_p5 = scmp.lt.s32.totalorder %s1352_s26, 2 }
  0x24   : > { %p1491_p4 = por %p196_p13, %p54_p8  ;;  %s267_s16 = sand.u32 1, %s1340_s23  }
  0x25   : > { %s1497_s14 = scalar_select %p45_p0, %s1340_s23, %s47_s9  }
  0x26   : > { %p1499_p7 = por %p202_p2, %p60_p10  ;;  %s917_s17 = sshll.u32 %s267_s16, 3 }
  0x27   : > { %1646 = sst [smem:[#allocation20_spill]] %s1497_s14  ;;  %s918_s18 = sshll.u32 %s1348_s25, 3 }
  0x28   : > { %s276_s28 = scalar_lea.hbm %s1622_s0, %s918_s18  ;;  %s271_s29 = scalar_lea.vmem [#allocation2], %s917_s17 }
  0x29   : > { %s280_s30 = sshll.u32 %s271_s29, 4  ;;  %s278_s12 = sshll.u32 %s276_s28, 4  ;;  %s281_s30 = int_to_ptr.vmem [resolvable:$true] %s280_s30  ;;  %s279_s12 = int_to_ptr.hbm [resolvable:$true] %s278_s12 }
  0x2a   : > { %p1002_p8 = pnand %p1015_p5, %p1478_p11  ;;  %s295_s3 = scalar_lea.hbm %s1623_s1, %s918_s18 }
  0x2b   : > { %s287_s4 = sand.u32 1, %s1352_s26   ;;  %s268_s8 = scalar_lea.sflag [#allocation3], %s267_s16 }
  0x2c   : > { %1004 = dma.hbm_to_vmem [thread:$0]  (!%p1002_p8), %s279_s12, 128, %s281_s30, %s268_s8  }
  0x2d   : > { %s297_s14 = sshll.u32 %s295_s3, 4  ;;  %s291_s25 = scalar_lea.vmem [#allocation5], %s917_s17  ;;  %s298_s14 = int_to_ptr.hbm [resolvable:$true] %s297_s14 }
  0x2e   : > { %s299_s23 = sshll.u32 %s291_s25, 4  ;;  %s288_s19 = scalar_lea.sflag [#allocation6], %s287_s4  ;;  %s300_s23 = int_to_ptr.vmem [resolvable:$true] %s299_s23 }
  0x2f   : > { %1007 = dma.hbm_to_vmem [thread:$0]  (!%p1002_p8), %s298_s14, 128, %s300_s23, %s288_s19  }
  0x30   : > { %308 = sbr.rel (%p1443_p3) target bundleno = 1161 (0x489), region = 44  ;;  %s1517_s11 = sand.u32 (!%p1443_p3), 1, %s1336_s22  }
  0x31   : > { %s1520_s2 = sshll.u32 (!%p1443_p3), %s1517_s11, 3  ;;  %s311_s8 = scalar_lea.sflag (!%p1443_p3), [#allocation3], %s1517_s11 }
  0x32   : > { %s314_s3 = scalar_lea.vmem (!%p1443_p3), [#allocation2], %s1520_s2 }
  0x35   : > { %1311 = dma.done.wait (%p1484_p12), %s311_s8, 128  }
  0x36   : > { %1313 = vsyncadd (%p1484_p12), %s311_s8, 4294967168  ;;  %s320_s4 = sand.u32 1, %s1435_s27   ;;  %s324_s25 = scalar_lea.vmem [#allocation5], %s1520_s2 }
  0x37   : > { %s321_s23 = scalar_lea.sflag [#allocation6], %s320_s4 }
  0x38   : > { %1315 = dma.done.wait (%p1484_p12), %s321_s23, 128  }
  0x39   : > { %1317 = vsyncadd (%p1484_p12), %s321_s23, 4294967168 }
  0x3a   : > { %1319 = dma.done.wait (%p61_p1), [#allocation6], 256  }
  0x3b   : > { %1321 = vsyncadd (%p61_p1), [#allocation6], 4294967040 }
  0x3c   : > { %1323 = dma.done.wait (%p61_p1), [#allocation9], 512  }
  0x3d   : > { %1325 = vsyncadd (%p61_p1), [#allocation9], 4294966784  ;;  %v968_v0 = vld [vmem:[#allocation7 + $0x8] sm:$0xff]  ;;  %v970_v1 = vld [vmem:[#allocation8 + $0x8] sm:$0xff]  ;;  %vm393_vm0 = vcmask 261120   ;;  %vm446_vm1 = vcmask 64512  }
  0x3e   : > { %v967_v2 = vld [vmem:[#allocation7] sm:$0xff]  ;;  %v969_v3 = vld [vmem:[#allocation8] sm:$0xff]  ;;  %403 = vmatpush.bf16.msra.mxu0 %v968_v0  ;;  %438 = vmatpush.bf16.msra.mxu1 %v970_v1  ;;  %s1359_s27 = smov 112   ;;  %s1360_s7 = smov 120   ;;  %vm489_vm2 = vcmask 1043456   ;;  %vm720_vm3 = vcmask 130048  }
  0x3f   : > { %v375_v4 = vld [vmem:[%s314_s3] sm:$0xff]  ;;  %v411_v5 = vld [vmem:[%s324_s25] sm:$0xff]  ;;  %s1361_s10 = smov 104   ;;  %s1362_s14 = smov 96   ;;  %vm723_vm4 = vcmask 195584  }
  0x40   : > { %v376_v6 = vpack.c.bf16 %v375_v4, %v375_v4  ;;  %v412_v7 = vpack.c.bf16 %v411_v5, %v411_v5  ;;  %s1363_s16 = smov 88   ;;  %s1364_s17 = smov 80  }
  0x41   : > { %s1365_s18 = smov 72   ;;  %s1366_s20 = smov 16  }
  0x42   : > { %404 = vmatpush.bf16.msra.mxu0 %v967_v2  ;;  %439 = vmatpush.bf16.msra.mxu1 %v969_v3  ;;  %s1367_s28 = smov 8   ;;  %s1368_s29 = smov 24  }
  0x43   : > { %s964_s30 = sshll.u32 %s1344_s24, 3  ;;  %s373_s4 = scalar_lea.vmem [#allocation11], %s1520_s2 }
  0x44   : > { %s774_s19 = scalar_lea.hbm %s1628_s6, %s964_s30  ;;  %s776_s23 = sshll.u32 %s373_s4, 4  ;;  %s777_s23 = int_to_ptr.vmem [resolvable:$true] %s776_s23 }
  0x45   : > { %936 = vmatmul.msk.bf16.vlgmr.msra.gmra.mxu0 %vm393_vm0, %v376_v6  ;;  %945 = vmatmul.msk.bf16.vlgmr.msra.gmra.mxu1 %vm393_vm0, %v412_v7  ;;  %s778_s25 = sshll.u32 %s774_s19, 4  ;;  %s1278_s2 = scalar_lea.hbm %s1628_s6, 16  ;;  %s779_s25 = int_to_ptr.hbm [resolvable:$true] %s778_s25 }
  0x46   : > { %s1272_s24 = sshra.s32 %s779_s25, 4  ;;  %s1273_s24 = int_to_ptr.hbm [resolvable:$true] %s1272_s24 }
  0x47   : > { %p1279_p10 = scmp.lt.s32.totalorder %s1273_s24, %s1628_s6 }
  0xc2   : > { %v406_v8 = vpop.f32.mrf.mxu0  ;;  %v441_v9 = vpop.f32.mrf.mxu1 }
  0xc3   : > { %v445_v10 = vpack.c.bf16 %v441_v9, %v441_v9  ;;  %v410_v11 = vpack.c.bf16 %v406_v8, %v406_v8 }
  0xc5   : > { %v482_v12 = vunpack.c.l.b16 %v445_v10  ;;  %v451_v13 = vsel %vm446_vm1, %v445_v10, 0  ;;  %v511_v15 = vunpack.c.l.b16 %v410_v11 }
  0xc6   : > { %460 = vmatpush.bf16.xpose.msra.mxu2 %v451_v13 }
  0xc7   : > { %v1545_v14 = vpack.c.b16 %v482_v12, %v482_v12  ;;  %v512_v18 = vpack.c.b16 %v511_v15, %v511_v15 }
  0xc9   : > { %578 = vrot.lane.b32.xlu2 %v1545_v14, %s1359_s27  ;;  %515 = vrot.lane.b32.xlu1 %v1545_v14, %s1360_s7 }
  0xca   : > { %v408_v16 = vpop.f32.mrf.mxu0  ;;  %v443_v17 = vpop.f32.mrf.mxu1 }
  0xcd   : > { %946 = vmatmul.msk.bf16.vlgmr.msra.gmra.mxu2 %vm446_vm1, %v410_v11 }
  0xd1   : > { %641 = vrot.lane.b32.xlu2 %v1545_v14, %s1361_s10  ;;  %513 = vrot.lane.b32.xlu1 %v512_v18, %s1360_s7  ;;  %s1274_s7 = scalar_lea.hbm %s1273_s24, 8 }
  0xd2   : > { %p1275_p1 = scmp.ne.s32.totalorder %s1273_s24, %s1274_s7  ;;  %p1280_p11 = scmp.lt.s32.totalorder %s1278_s2, %s1274_s7 }
  0xd4   : > { %p1276_p3 = pnand %p1275_p1, %p1491_p4  ;;  %p1281_p12 = por %p1280_p11, %p1279_p10 }
  0xd6   : > { %p1277_p9 = pneg %p1276_p3 }
  0xd8   : > { %p1282_p13 = pnand %p1281_p12, %p1277_p9 }
  0xd9   : > { %639 = vrot.lane.b32.xlu2 %v512_v18, %s1361_s10  ;;  %576 = vrot.lane.b32.xlu1 %v512_v18, %s1359_s27  ;;  %s763_s27 = scalar_lea.sflag [#allocation4], %s1517_s11 }
 0x123   : > { %v579_v19 = vpop.permute.xlu2 %578 }
 0x124   : > { %v584_v20 = vsel %vm446_vm1, %v579_v19, 0 }
 0x125   : > { %593 = vmatpush.bf16.xpose.msrb.mxu1 %v584_v20 }
 0x12b   : > { %v642_v36 = vpop.permute.xlu2 %641 }
 0x12c   : > { %v647_v39 = vsel %vm446_vm1, %v642_v36, 0 }
 0x133   : > { %v640_v42 = vpop.permute.xlu2 %639 }
 0x13b   : > { %v516_v21 = vpop.permute.xlu1 %515 }
 0x13c   : > { %v521_v37 = vsel %vm446_vm1, %v516_v21, 0 }
 0x143   : > { %v514_v22 = vpop.permute.xlu1 %513 }
 0x14b   : > { %v577_v23 = vpop.permute.xlu1 %576 }
 0x14c   : > { %950 = vmatmul.msk.bf16.vlgmr.msrb.gmra.mxu1 %vm446_vm1, %v577_v23 }
 0x150   : > { %v462_v24 = vpop.f32.mrf.mxu2 }
 0x151   : > { %v466_v25 = vsel %vm446_vm1, %v462_v24, -inf }
 0x152   : > { %467 = vmax.xlane.f32.xlu0 %v466_v25 }
 0x158   : > { %v464_v26 = vpop.f32.mrf.mxu2 }
 0x166   : > { %484 = vrot.lane.b32.xlu0 %v1545_v14, %s1362_s14 }
 0x16e   : > { %551 = vrot.lane.b32.xlu0 %v1545_v14, %s1363_s16 }
 0x1c5   : > { %v468_v27 = vpop.xlane.xlu0 %467 }
 0x1c6   : > { %v472_v29 = vsub.f32 %v462_v24, %v468_v27  ;;  %v469_v50 = vsub.f32 -inf, %v468_v27 }
 0x1c8   : > { %v473_v31 = vmul.f32 1.442695, %v472_v29  ;;  %v470_v51 = vmul.f32 1.442695, %v469_v50 }
 0x1c9   : > { %v595_v28 = vpop.f32.mrf.mxu1 }
 0x1ca   : > { %v599_v30 = vsel %vm446_vm1, %v595_v28, -inf  ;;  %1084 = vpow2.f32 %v473_v31 }
 0x1cb   : > { %600 = vmax.xlane.f32.xlu2 %v599_v30 }
 0x1d0   : > { %v1085_v33 = vpop.eup %1084 }
 0x1d1   : > { %v597_v32 = vpop.f32.mrf.mxu1  ;;  %v480_v38 = vpack.c.bf16 %v1085_v33, %v1085_v33  ;;  %v476_v63 = vsel %vm446_vm1, %v1085_v33, 0.0 }
 0x1d8   : > { %v485_v34 = vpop.permute.xlu0 %484 }
 0x1d9   : > { %v491_v35 = vsel %vm489_vm2, %v485_v34, 0 }
 0x1da   : > { %500 = vmatpush.bf16.msra.mxu3 %v491_v35 }
 0x1dd   : > { %947 = vmatmul.msk.bf16.vlgmr.msra.gmra.mxu3 %vm446_vm1, %v480_v38 }
 0x1de   : > { %530 = vmatpush.bf16.xpose.msrb.mxu3 %v521_v37 }
 0x1e0   : > { %v552_v40 = vpop.permute.xlu0 %551 }
 0x1e1   : > { %v557_v41 = vsel %vm489_vm2, %v552_v40, 0 }
 0x1e2   : > { %566 = vmatpush.bf16.msrb.mxu0 %v557_v41 }
 0x1e3   : > { %614 = vrot.lane.b32.xlu2 %v1545_v14, %s1364_s17 }
 0x1e6   : > { %656 = vmatpush.bf16.xpose.msra.mxu3 %v647_v39 }
 0x1ed   : > { %948 = vmatmul.msk.bf16.vlgmr.msrb.gmra.mxu3 %vm446_vm1, %v514_v22 }
 0x1fd   : > { %952 = vmatmul.msk.bf16.vlgmr.msra.gmra.mxu3 %vm446_vm1, %v640_v42 }
 0x23e   : > { %v601_v43 = vpop.xlane.xlu2 %600 }
 0x23f   : > { %v605_v44 = vsub.f32 %v595_v28, %v601_v43  ;;  %v602_v0 = vsub.f32 -inf, %v601_v43 }
 0x241   : > { %v606_v45 = vmul.f32 1.442695, %v605_v44  ;;  %v603_v1 = vmul.f32 1.442695, %v602_v0 }
 0x243   : > { %1086 = vpow2.f32 %v606_v45 }
 0x244   : > { %1088 = vpow2.f32 %v470_v51 }
 0x245   : > { %1090 = vpow2.f32 %v603_v1 }
 0x246   : > { %v615_v46 = vpop.permute.xlu2 %614 }
 0x247   : > { %v620_v47 = vsel %vm489_vm2, %v615_v46, 0 }
 0x248   : > { %629 = vmatpush.bf16.msrb.mxu2 %v620_v47 }
 0x249   : > { %v1087_v48 = vpop.eup %1086 }
 0x24a   : > { %v613_v49 = vpack.c.bf16 %v1087_v48, %v1087_v48  ;;  %v1089_v52 = vpop.eup %1088  ;;  %v609_v16 = vsel %vm446_vm1, %v1087_v48, 0.0 }
 0x24b   : > { %v475_v53 = vmul.f32 0.0, %v1089_v52  ;;  %v1091_v2 = vpop.eup %1090 }
 0x24c   : > { %951 = vmatmul.msk.bf16.vlgmr.msrb.gmra.mxu2 %vm446_vm1, %v613_v49  ;;  %v608_v3 = vmul.f32 0.0, %v1091_v2 }
 0x260   : > { %v502_v54 = vpop.f32.mrf.mxu3 }
 0x261   : > { %v506_v55 = vadd.f32 %v502_v54, %v475_v53 }
 0x268   : > { %v504_v56 = vpop.f32.mrf.mxu3 }
 0x270   : > { %v532_v57 = vpop.f32.mrf.mxu3 }
 0x271   : > { %v536_v58 = vsel %vm446_vm1, %v532_v57, -inf }
 0x272   : > { %537 = vmax.xlane.f32.xlu1 %v536_v58 }
 0x278   : > { %v534_v59 = vpop.f32.mrf.mxu3 }
 0x280   : > { %v658_v60 = vpop.f32.mrf.mxu3 }
 0x281   : > { %v662_v61 = vsel %vm446_vm1, %v658_v60, -inf }
 0x282   : > { %663 = vmax.xlane.f32.xlu0 %v662_v61  ;;  %v972_v61 = vld [vmem:[#allocation10 + $0x8] sm:$0xff] }
 0x283   : > { %754 = vmatpush.bf16.msra.mxu1 %v972_v61 }
 0x288   : > { %v660_v62 = vpop.f32.mrf.mxu3 }
 0x289   : > { %v971_v62 = vld [vmem:[#allocation10] sm:$0xff] }
 0x28a   : > { %755 = vmatpush.bf16.msra.mxu1 %v971_v62 }
 0x28b   : > { %677 = vrot.lane.b32.xlu1 %v1545_v14, %s1365_s18 }
 0x2b5   : > { %477 = vadd.xlane.f32.xlu1 %v476_v63 }
 0x2cf   : > { %v631_v4 = vpop.f32.mrf.mxu2 }
 0x2d0   : > { %v635_v5 = vadd.f32 %v631_v4, %v608_v3 }
 0x2d7   : > { %v633_v6 = vpop.f32.mrf.mxu2 }
 0x2d8   : > { %v1083_v6 = vld [vmem:[%s1627_s5] ss:$0 sm:$0xff] }
 0x2e5   : > { %v538_v7 = vpop.xlane.xlu1 %537 }
 0x2e6   : > { %v542_v8 = vsub.f32 %v532_v57, %v538_v7  ;;  %v539_v26 = vsub.f32 -inf, %v538_v7 }
 0x2e8   : > { %v543_v9 = vmul.f32 1.442695, %v542_v8  ;;  %v540_v27 = vmul.f32 1.442695, %v539_v26 }
 0x2ea   : > { %1092 = vpow2.f32 %v543_v9 }
 0x2f0   : > { %v1093_v10 = vpop.eup %1092 }
 0x2f1   : > { %v546_v11 = vsel %vm446_vm1, %v1093_v10, 0.0  ;;  %v550_v12 = vpack.c.bf16 %v1093_v10, %v1093_v10 }
 0x2f2   : > { %547 = vadd.xlane.f32.xlu0 %v546_v11 }
 0x2f3   : > { %949 = vmatmul.msk.bf16.vlgmr.msrb.gmra.mxu0 %vm446_vm1, %v550_v12 }
 0x2f5   : > { %v664_v13 = vpop.xlane.xlu0 %663 }
 0x2f6   : > { %v668_v14 = vsub.f32 %v658_v60, %v664_v13  ;;  %v665_v28 = vsub.f32 -inf, %v664_v13 }
 0x2f8   : > { %v669_v15 = vmul.f32 1.442695, %v668_v14  ;;  %v666_v31 = vmul.f32 1.442695, %v665_v28 }
 0x2fa   : > { %1094 = vpow2.f32 %v669_v15  ;;  %610 = vadd.xlane.f32.xlu0 %v609_v16 }
 0x2fd   : > { %v678_v17 = vpop.permute.xlu1 %677 }
 0x2fe   : > { %v683_v18 = vsel %vm489_vm2, %v678_v17, 0 }
 0x2ff   : > { %692 = vmatpush.bf16.msra.mxu0 %v683_v18 }
 0x300   : > { %v1095_v19 = vpop.eup %1094 }
 0x301   : > { %v676_v20 = vpack.c.bf16 %v1095_v19, %v1095_v19  ;;  %v672_v21 = vsel %vm446_vm1, %v1095_v19, 0.0 }
 0x302   : > { %673 = vadd.xlane.f32.xlu2 %v672_v21 }
 0x303   : > { %953 = vmatmul.msk.bf16.vlgmr.msra.gmra.mxu0 %vm446_vm1, %v676_v20 }
 0x328   : > { %v478_v22 = vpop.xlane.xlu1 %477 }
 0x329   : > { %v479_v23 = vadd.f32 %v478_v22, %v475_v53 }
 0x32b   : > { %1096 = vrcp.f32 %v479_v23 }
 0x32c   : > { %1098 = vpow2.f32 %v540_v27 }
 0x32d   : > { %1100 = vpow2.f32 %v666_v31 }
 0x331   : > { %v1097_v24 = vpop.eup %1096 }
 0x332   : > { %v508_v25 = vmul.f32 %v1097_v24, %v506_v55  ;;  %v1099_v30 = vpop.eup %1098 }
 0x333   : > { %v545_v32 = vmul.f32 0.0, %v1099_v30  ;;  %v1101_v37 = vpop.eup %1100 }
 0x334   : > { %v671_v41 = vmul.f32 0.0, %v1101_v37  ;;  %v509_v1 = vpack.c.bf16 %v508_v25, %v508_v25 }
 0x365   : > { %v548_v29 = vpop.xlane.xlu0 %547 }
 0x366   : > { %v549_v34 = vadd.f32 %v548_v29, %v545_v32 }
 0x36d   : > { %v611_v33 = vpop.xlane.xlu0 %610 }
 0x36e   : > { %v612_v35 = vadd.f32 %v611_v33, %v608_v3 }
 0x370   : > { %1102 = vrcp.f32 %v612_v35  ;;  %v568_v36 = vpop.f32.mrf.mxu0 }
 0x371   : > { %1104 = vrcp.f32 %v549_v34  ;;  %v572_v38 = vadd.f32 %v568_v36, %v545_v32 }
 0x375   : > { %v674_v39 = vpop.xlane.xlu2 %673 }
 0x376   : > { %v1103_v40 = vpop.eup %1102  ;;  %v675_v44 = vadd.f32 %v674_v39, %v671_v41 }
 0x377   : > { %v637_v42 = vmul.f32 %v1103_v40, %v635_v5  ;;  %v1105_v43 = vpop.eup %1104 }
 0x378   : > { %v570_v45 = vpop.f32.mrf.mxu0  ;;  %v574_v46 = vmul.f32 %v1105_v43, %v572_v38  ;;  %1106 = vrcp.f32 %v675_v44 }
 0x379   : > { %v638_v47 = vpack.c.bf16 %v637_v42, %v637_v42 }
 0x37a   : > { %v575_v49 = vpack.c.bf16 %v574_v46, %v574_v46 }
 0x37b   : > { %v708_v48 = vunpack.c.l.b16 %v638_v47 }
 0x37c   : > { %v703_v52 = vunpack.c.l.b16 %v575_v49 }
 0x37d   : > { %v709_v50 = vpack.c.b16 %v708_v48, %v708_v48 }
 0x37e   : > { %v1107_v54 = vpop.eup %1106  ;;  %v704_v57 = vpack.c.b16 %v703_v52, %v703_v52 }
 0x37f   : > { %710 = vrot.lane.b32.xlu0 %v709_v50, %s1366_s20 }
 0x380   : > { %v694_v51 = vpop.f32.mrf.mxu0 }
 0x381   : > { %v698_v53 = vadd.f32 %v694_v51, %v671_v41 }
 0x383   : > { %v700_v55 = vmul.f32 %v1107_v54, %v698_v53 }
 0x385   : > { %v701_v56 = vpack.c.bf16 %v700_v55, %v700_v55 }
 0x387   : > { %705 = vrot.lane.b32.xlu0 %v704_v57, %s1367_s28  ;;  %v713_v59 = vunpack.c.l.b16 %v701_v56 }
 0x388   : > { %v696_v58 = vpop.f32.mrf.mxu0 }
 0x389   : > { %v714_v60 = vpack.c.b16 %v713_v59, %v713_v59 }
 0x38f   : > { %715 = vrot.lane.b32.xlu0 %v714_v60, %s1368_s29 }
 0x3f1   : > { %v711_v63 = vpop.permute.xlu0 %710 }
 0x3f9   : > { %v706_v0 = vpop.permute.xlu0 %705 }
 0x3fa   : > { %v719_v2 = vsel %vm446_vm1, %v509_v1, %v706_v0 }
 0x3fb   : > { %v722_v3 = vsel %vm720_vm3, %v719_v2, %v711_v63 }
 0x401   : > { %v716_v4 = vpop.permute.xlu0 %715 }
 0x402   : > { %v725_v5 = vsel %vm723_vm4, %v722_v3, %v716_v4 }
 0x403   : > { %962 = vmatmul.msk.bf16.vlgmr.msra.gmra.mxu1 %vm393_vm0, %v725_v5 }
 0x480   : > { %v757_v7 = vpop.f32.mrf.mxu1 }
 0x481   : > { %v758_v8 = vadd.f32 %v1083_v6, %v757_v7 }
 0x483   : > { %761 = vst.msk [vmem:[%s373_s4] sm:$0xff] %vm393_vm0, %v758_v8 }
 0x484   : > { %1285 = shalt.err (!%p1282_p13)
}
 0x485   : > { %989 = dma.vmem_to_hbm [thread:$0]  (%p1491_p4), %s777_s23, 128, %s779_s25, %s763_s27  }
 0x488   : > { %v759_v9 = vpop.f32.mrf.mxu1 }
 0x489 PF: > { %s790_s11 = sand.u32 1, %s1332_s21   ;;  %p1009_p0 = pnand %p916_p6, %p1499_p7 }
 0x48a   : > { %s791_s18 = scalar_lea.sflag [#allocation4], %s790_s11 }
 0x48b   : > { %p1010_p2 = pneg %p1009_p0 }
 0x48d   : > { %1327 = dma.done.wait (%p1010_p2), %s791_s18, 128  }
 0x48e   : > { %1329 = vsyncadd (%p1010_p2), %s791_s18, 4294967168  ;;  %s26_s26 = sadd.s32 1, %s1352_s26   ;;  %s1648_s20 = sld [smem:[#allocation17_spill]] }
 0x48f   : > { %p23_p5 = scmp.ge.s32.totalorder %s26_s26, 4   ;;  %s1649_s23 = sld [smem:[#allocation20_spill]] }
 0x490   : > { %s1650_s24 = sld [smem:[#allocation18_spill]]  ;;  %s1652_s21 = smov %s1336_s22 }
 0x491   : > { %s1651_s25 = sld [smem:[#allocation19_spill]]  ;;  %25 = sbr.rel (!%p23_p5) target bundleno = 13 (0xd), region = 114 }
 0x494   : > { %s1653_s22 = smov %s1648_s20 }
 0x496   :  { %797 = vsyncpa [#allocation3], 1 }
 0x497   :  { %799 = vsyncpa [#allocation3 + $0x1], 1 }
 0x498   :  { %800 = vsyncpa [#allocation6], 1 }
 0x499   :  { %802 = vsyncpa [#allocation6 + $0x1], 1 }
 0x49a   :  { %803 = vsyncpa [#allocation9], 1 }
 0x49b   :  { %804 = vsyncpa [#allocation4], 1 }
 0x49c   :  { %806 = vsyncpa [#allocation4 + $0x1], 1 }

</bundles_post_ra>
